<compile_context>
chip_gen: v7x
topology: tpu7x:2x2x1
jax: 0.10.0
libtpu: 0.0.40
codegen_flags: <defaults>
</compile_context>

<pallas_src>
import jax
import jax.numpy as jnp
from jax import lax
from jax.experimental import pallas as pl
from jax.experimental.pallas import tpu as pltpu

EMBED_DIM = 1440
CPAD = 1536                 # 12 * 128 lanes (zero-padded K; result unchanged)
HIDDEN = 384
FUSED = 2 * HIDDEN          # 768 = 6 * 128 lanes, both heads fused
STAGE_CHANNELS = (96, 192, 384, 768)   # sums to 1440 like convnext_tiny features_only


# ----------------------------------------------------------------------------
# Pallas head kernel
# ----------------------------------------------------------------------------
def _head_kernel(feats_ref, w1_ref, b1_ref, w2_ref, b2_ref, y_ref,
                 acc_num, acc_den):
    t = pl.program_id(1)

    @pl.when(t == 0)
    def _():
        acc_num[...] = jnp.zeros_like(acc_num)
        acc_den[...] = jnp.zeros_like(acc_den)

    # Fused first layers of both heads: one 2-D bf16 MXU matmul, f32 accumulate.
    f = feats_ref[...]                                               # (TN, 1536) bf16
    h = jnp.dot(f, w1_ref[...], preferred_element_type=jnp.float32)  # (TN, 768) f32
    h = jnp.maximum(h + b1_ref[...], 0.0)                            # ReLU (Dropout=id)

    # Second layers (384 -> 1) as VPU multiply + lane reduction (no MXU pass).
    prod = h * w2_ref[...]                                           # (TN, 768)
    s_pre = jnp.sum(prod[:, :HIDDEN], axis=-1, keepdims=True) + b2_ref[0]
    w_pre = jnp.sum(prod[:, HIDDEN:], axis=-1, keepdims=True) + b2_ref[1]
    scores = jnp.maximum(s_pre, 0.0)                                 # (TN, 1) ReLU
    weights = jax.nn.sigmoid(w_pre)                                  # (TN, 1) Sigmoid

    acc_num[...] += jnp.sum(scores * weights, axis=0, keepdims=True)  # (1, 1)
    acc_den[...] += jnp.sum(weights, axis=0, keepdims=True)           # (1, 1)

    @pl.when(t == pl.num_programs(1) - 1)
    def _():
        val = acc_num[...] * pl.reciprocal(acc_den[...], approx=True)  # (1, 1)
        y_ref[...] = val.reshape(1, 1, 1).astype(y_ref.dtype)


def _choose_token_tile(n_tokens):
    # Biggest MXU-friendly token tile that divides N; tiny N -> full extent.
    for cand in (512, 256, 128, 64, 32, 16, 8):
        if n_tokens % cand == 0:
            return cand
    return n_tokens


def cpnet_head_pallas(feats, p):
    """feats: (B, N, 1440) float32 tokens.  Returns (B, 1) float32 scores."""
    B, N, C = feats.shape
    assert C == EMBED_DIM
    tn = _choose_token_tile(N)
    n_t = N // tn

    # Lane-pad C 1440 -> 1536 with zeros and cast to bf16 (f32 accumulate in-kernel).
    feats_p = jnp.pad(feats, ((0, 0), (0, 0), (0, CPAD - C))).astype(jnp.bfloat16)

    # Pack both heads' first layers into one (1536, 768) bf16 matrix + (1,768) bias.
    w1 = jnp.concatenate([p['ws1'], p['ww1']], axis=1)                  # (1440, 768)
    w1 = jnp.pad(w1, ((0, CPAD - C), (0, 0))).astype(jnp.bfloat16)      # (1536, 768)
    b1 = jnp.concatenate([p['bs1'], p['bw1']], axis=1)                  # (1, 768) f32
    # Second layers as a packed row vector + two scalar biases (SMEM).
    w2 = jnp.concatenate([p['ws2'][:, 0], p['ww2'][:, 0]])[None, :]     # (1, 768) f32
    b2 = jnp.concatenate([p['bs2'].reshape(-1), p['bw2'].reshape(-1)])  # (2,)   f32

    flops = 2 * B * N * CPAD * FUSED + 4 * B * N * FUSED
    bytes_acc = (B * N * CPAD * 2 + CPAD * FUSED * 2 + 3 * FUSED * 4 + B * 4)
    cost = pl.CostEstimate(flops=flops, transcendentals=B * N,
                           bytes_accessed=bytes_acc)

    # VMEM budget: double-buffered feats tile + resident (double-buffered) weights.
    tile_bytes = tn * CPAD * 2
    w_bytes = CPAD * FUSED * 2 + 2 * FUSED * 4
    vmem_limit = int(min(max(2 * (tile_bytes + w_bytes) + (6 << 20), 16 << 20),
                         48 << 20))

    grid_spec = pltpu.PrefetchScalarGridSpec(
        num_scalar_prefetch=0,
        grid=(B, n_t),
        in_specs=[
            pl.BlockSpec((None, tn, CPAD), lambda b, t: (b, t, 0)),   # feats tile
            pl.BlockSpec((CPAD, FUSED), lambda b, t: (0, 0)),         # fused W1 (resident)
            pl.BlockSpec((1, FUSED), lambda b, t: (0, 0)),            # fused b1
            pl.BlockSpec((1, FUSED), lambda b, t: (0, 0)),            # packed w2 row
            pl.BlockSpec(memory_space=pltpu.MemorySpace.SMEM),        # (bs2, bw2) scalars
        ],
        out_specs=pl.BlockSpec((1, 1, 1), lambda b, t: (b, 0, 0)),
        scratch_shapes=[pltpu.VMEM((1, 1), jnp.float32),   # num accumulator
                        pltpu.VMEM((1, 1), jnp.float32)],  # den accumulator
    )

    y3 = pl.pallas_call(
        _head_kernel,
        out_shape=jax.ShapeDtypeStruct((B, 1, 1), jnp.float32),
        grid_spec=grid_spec,
        compiler_params=pltpu.CompilerParams(
            dimension_semantics=("parallel", "arbitrary"),
            vmem_limit_bytes=vmem_limit),
        cost_estimate=cost,
    )(feats_p, w1, b1, w2, b2)
    return y3.reshape(B, 1)


# ----------------------------------------------------------------------------
# Plain-JAX glue: NHWC stand-in backbone, exact adaptive average pool, tokens.
# ----------------------------------------------------------------------------
def _conv_nhwc(x, w, b, stride):
    y = lax.conv_general_dilated(
        x, w, window_strides=(stride, stride), padding='VALID',
        dimension_numbers=('NHWC', 'HWIO', 'NHWC'))
    return jax.nn.gelu(y + b[None, None, None, :])


def backbone_standin(x_nhwc, bp):
    # strides 4, 8, 16, 32 wrt the input; channels 96/192/384/768
    f0 = _conv_nhwc(x_nhwc, bp['w0'], bp['b0'], 4)
    f1 = _conv_nhwc(f0, bp['w1'], bp['b1'], 2)
    f2 = _conv_nhwc(f1, bp['w2'], bp['b2'], 2)
    f3 = _conv_nhwc(f2, bp['w3'], bp['b3'], 2)
    return [f0, f1, f2, f3]


def adaptive_avg_pool_nhwc(x, out_size):
    # exact nn.AdaptiveAvgPool2d when H, W are divisible by out_size
    B, H, W, C = x.shape
    return x.reshape(B, out_size, H // out_size,
                     out_size, W // out_size, C).mean(axis=(2, 4))


def extract_features(x_nchw, bp, csize):
    """Returns (B, (csize//32)^2, 1440) float32 tokens (channels-last)."""
    P = csize // 32
    x = jnp.transpose(x_nchw, (0, 2, 3, 1))            # NCHW -> NHWC, once
    feats = backbone_standin(x, bp)
    feats = [adaptive_avg_pool_nhwc(f, P) for f in feats]
    feats = jnp.concatenate(feats, axis=-1)            # (B, P, P, 1440)
    B = feats.shape[0]
    return feats.reshape(B, P * P, EMBED_DIM)          # 'b c h w -> b (h w) c'


def cpnet_forward(x, params, csize):
    feats = extract_features(x, params['backbone'], csize)
    return cpnet_head_pallas(feats, params['head'])


# ----------------------------------------------------------------------------
# Deterministic parameter init
# ----------------------------------------------------------------------------
def init_params(key):
    ks = jax.random.split(key, 8)

    def lin(k, fan_in, fan_out):
        kw, kb = jax.random.split(k)
        scale = 1.0 / jnp.sqrt(fan_in)
        w = jax.random.uniform(kw, (fan_in, fan_out), jnp.float32, -scale, scale)
        b = jax.random.uniform(kb, (1, fan_out), jnp.float32, -scale, scale)
        return w, b

    def conv_w(k, kh, kw, cin, cout):
        return jax.random.normal(k, (kh, kw, cin, cout), jnp.float32) * 0.05

    backbone = {
        'w0': conv_w(ks[0], 4, 4, 3, STAGE_CHANNELS[0]),
        'b0': jnp.zeros((STAGE_CHANNELS[0],), jnp.float32),
        'w1': conv_w(ks[1], 2, 2, STAGE_CHANNELS[0], STAGE_CHANNELS[1]),
        'b1': jnp.zeros((STAGE_CHANNELS[1],), jnp.float32),
        'w2': conv_w(ks[2], 2, 2, STAGE_CHANNELS[1], STAGE_CHANNELS[2]),
        'b2': jnp.zeros((STAGE_CHANNELS[2],), jnp.float32),
        'w3': conv_w(ks[3], 2, 2, STAGE_CHANNELS[2], STAGE_CHANNELS[3]),
        'b3': jnp.zeros((STAGE_CHANNELS[3],), jnp.float32),
    }

    ws1, bs1 = lin(ks[4], EMBED_DIM, HIDDEN)
    ws2, bs2 = lin(ks[5], HIDDEN, 1)
    ww1, bw1 = lin(ks[6], EMBED_DIM, HIDDEN)
    ww2, bw2 = lin(ks[7], HIDDEN, 1)
    head = {'ws1': ws1, 'bs1': bs1, 'ws2': ws2, 'bs2': bs2,
            'ww1': ww1, 'bw1': bw1, 'ww2': ww2, 'bw2': bw2}
    return {'backbone': backbone, 'head': head}


# Pure-JAX (f32) reference of the head for a numerical sanity check.
def head_ref(feats, p):
    hs = jnp.maximum(feats @ p['ws1'] + p['bs1'], 0.0)
    s = jnp.maximum(hs @ p['ws2'] + p['bs2'], 0.0)
    hw = jnp.maximum(feats @ p['ww1'] + p['bw1'], 0.0)
    w = jax.nn.sigmoid(hw @ p['ww2'] + p['bw2'])
    return jnp.sum(s * w, axis=1) / jnp.sum(w, axis=1)


if __name__ == "__main__":
    key = jax.random.PRNGKey(0)
    k_params, k_x = jax.random.split(key)

    csize = 64                                   # small args.csize, divisible by 32
    B = 2
    x = jax.random.normal(k_x, (B, 3, csize, csize), jnp.float32)
    params = init_params(k_params)

    fwd = jax.jit(cpnet_forward, static_argnames='csize')
    y = jax.block_until_ready(fwd(x, params, csize=csize))
    assert y.shape == (B, 1)

    # Sanity check the Pallas head (bf16 matmul, f32 accumulate) vs f32 reference.
    feats = extract_features(x, params['backbone'], csize)
    y_ref = head_ref(feats, params['head'])
    assert jnp.allclose(y, y_ref, rtol=3e-2, atol=3e-2), (y, y_ref)

    print("KERNEL_OK")
</pallas_src>

<mosaic_0001>
module attributes {stable_mosaic.version = 11 : i64} {
  func.func @_head_kernel(%arg0: i32, %arg1: i32, %arg2: memref<1x4x1536xbf16, #tpu.memory_space<vmem>>, %arg3: memref<1536x768xbf16, #tpu.memory_space<vmem>>, %arg4: memref<1x768xf32, #tpu.memory_space<vmem>>, %arg5: memref<1x768xf32, #tpu.memory_space<vmem>>, %arg6: memref<2xf32, #tpu.memory_space<smem>>, %arg7: memref<1x1x1xf32, #tpu.memory_space<vmem>>, %arg8: memref<1x1xf32, #tpu.memory_space<vmem>>, %arg9: memref<1x1xf32, #tpu.memory_space<vmem>>) attributes {dimension_semantics = [#tpu.dimension_semantics<parallel>, #tpu.dimension_semantics<arbitrary>], iteration_bounds = array<i64: 2, 1>, scalar_prefetch = 0 : i64, scratch_operands = 2 : i64, tpu.core_type = #tpu.core_type<tc>, window_params = [{transform_indices = @transform_0, window_bounds = array<i64: 1, 4, 1536>}, {pipeline_mode = #tpu.pipeline_mode<synchronous>, transform_indices = @transform_1, window_bounds = array<i64: 1536, 768>}, {pipeline_mode = #tpu.pipeline_mode<synchronous>, transform_indices = @transform_2, window_bounds = array<i64: 1, 768>}, {pipeline_mode = #tpu.pipeline_mode<synchronous>, transform_indices = @transform_3, window_bounds = array<i64: 1, 768>}, {transform_indices = @transform_4, window_bounds = array<i64: 2>}, {transform_indices = @transform_5, window_bounds = array<i64: 1, 1, 1>}]} {
    %c0_i32 = arith.constant 0 : i32
    %0 = arith.cmpi eq, %arg1, %c0_i32 : i32
    %1 = arith.extui %0 : i1 to i32
    %c0_i32_0 = arith.constant 0 : i32
    %2 = arith.cmpi ne, %1, %c0_i32_0 : i32
    scf.if %2 {
      %cst_27 = arith.constant 0.000000e+00 : f32
      %48 = vector.broadcast %cst_27 : f32 to vector<1x1xf32>
      %c0_28 = arith.constant 0 : index
      %c0_29 = arith.constant 0 : index
      %49 = vector.load %arg8[%c0_28, %c0_29] : memref<1x1xf32, #tpu.memory_space<vmem>>, vector<1x1xf32>
      tpu.vector_store %arg8[%c0_28, %c0_29], %48 {strides = array<i32>} : memref<1x1xf32, #tpu.memory_space<vmem>>, vector<1x1xf32>,
      %cst_30 = arith.constant 0.000000e+00 : f32
      %50 = vector.broadcast %cst_30 : f32 to vector<1x1xf32>
      %c0_31 = arith.constant 0 : index
      %c0_32 = arith.constant 0 : index
      %51 = vector.load %arg9[%c0_31, %c0_32] : memref<1x1xf32, #tpu.memory_space<vmem>>, vector<1x1xf32>
      tpu.vector_store %arg9[%c0_31, %c0_32], %50 {strides = array<i32>} : memref<1x1xf32, #tpu.memory_space<vmem>>, vector<1x1xf32>,
    } else {
    }
    %c0 = arith.constant 0 : index
    %c0_1 = arith.constant 0 : index
    %c0_2 = arith.constant 0 : index
    %3 = vector.load %arg2[%c0, %c0_1, %c0_2] : memref<1x4x1536xbf16, #tpu.memory_space<vmem>>, vector<1x4x1536xbf16>
    %4 = vector.shape_cast %3 : vector<1x4x1536xbf16> to vector<4x1536xbf16>
    %c0_3 = arith.constant 0 : index
    %c0_4 = arith.constant 0 : index
    %5 = vector.load %arg3[%c0_3, %c0_4] : memref<1536x768xbf16, #tpu.memory_space<vmem>>, vector<1536x768xbf16>
    %cst = arith.constant dense<0.000000e+00> : vector<4x768xf32>
    %6 = tpu.matmul %4, %5, %cst {dimension_numbers = #tpu.dot_dimension_numbers<[1], [0], [0], [1], [0, 0, 1, 1], [], []>} : vector<4x1536xbf16>, vector<1536x768xbf16>, vector<4x768xf32> -> vector<4x768xf32>
    %c0_5 = arith.constant 0 : index
    %c0_6 = arith.constant 0 : index
    %7 = vector.load %arg4[%c0_5, %c0_6] : memref<1x768xf32, #tpu.memory_space<vmem>>, vector<1x768xf32>
    %8 = vector.broadcast %7 : vector<1x768xf32> to vector<4x768xf32>
    %9 = arith.addf %6, %8 : vector<4x768xf32>
    %cst_7 = arith.constant 0.000000e+00 : f32
    %10 = vector.broadcast %cst_7 : f32 to vector<4x768xf32>
    %11 = arith.maximumf %9, %10 : vector<4x768xf32>
    %c0_8 = arith.constant 0 : index
    %c0_9 = arith.constant 0 : index
    %12 = vector.load %arg5[%c0_8, %c0_9] : memref<1x768xf32, #tpu.memory_space<vmem>>, vector<1x768xf32>
    %13 = vector.broadcast %12 : vector<1x768xf32> to vector<4x768xf32>
    %14 = arith.mulf %11, %13 : vector<4x768xf32>
    %15 = vector.extract_strided_slice %14 {offsets = [0, 0], sizes = [4, 384], strides = [1, 1]} : vector<4x768xf32> to vector<4x384xf32>
    %cst_10 = arith.constant dense<0.000000e+00> : vector<4xf32>
    %16 = vector.multi_reduction <add>, %15, %cst_10 [1] : vector<4x384xf32> to vector<4xf32>
    %17 = vector.shape_cast %16 : vector<4xf32> to vector<4x1xf32>
    %c0_11 = arith.constant 0 : index
    %18 = memref.load %arg6[%c0_11] : memref<2xf32, #tpu.memory_space<smem>>
    %19 = vector.broadcast %18 : f32 to vector<4x1xf32>
    %20 = arith.addf %17, %19 : vector<4x1xf32>
    %21 = vector.extract_strided_slice %14 {offsets = [0, 384], sizes = [4, 384], strides = [1, 1]} : vector<4x768xf32> to vector<4x384xf32>
    %cst_12 = arith.constant dense<0.000000e+00> : vector<4xf32>
    %22 = vector.multi_reduction <add>, %21, %cst_12 [1] : vector<4x384xf32> to vector<4xf32>
    %23 = vector.shape_cast %22 : vector<4xf32> to vector<4x1xf32>
    %c1 = arith.constant 1 : index
    %24 = memref.load %arg6[%c1] : memref<2xf32, #tpu.memory_space<smem>>
    %25 = vector.broadcast %24 : f32 to vector<4x1xf32>
    %26 = arith.addf %23, %25 : vector<4x1xf32>
    %cst_13 = arith.constant 0.000000e+00 : f32
    %27 = vector.broadcast %cst_13 : f32 to vector<4x1xf32>
    %28 = arith.maximumf %20, %27 : vector<4x1xf32>
    %29 = arith.negf %26 : vector<4x1xf32>
    %30 = math.exp %29 : vector<4x1xf32>
    %cst_14 = arith.constant 1.000000e+00 : f32
    %31 = vector.broadcast %cst_14 : f32 to vector<4x1xf32>
    %32 = arith.addf %31, %30 : vector<4x1xf32>
    %33 = arith.divf %31, %32 : vector<4x1xf32>
    %c0_15 = arith.constant 0 : index
    %c0_16 = arith.constant 0 : index
    %34 = vector.load %arg8[%c0_15, %c0_16] : memref<1x1xf32, #tpu.memory_space<vmem>>, vector<1x1xf32>
    %35 = arith.mulf %28, %33 : vector<4x1xf32>
    %cst_17 = arith.constant dense<0.000000e+00> : vector<1xf32>
    %36 = vector.multi_reduction <add>, %35, %cst_17 [0] : vector<4x1xf32> to vector<1xf32>
    %37 = vector.shape_cast %36 : vector<1xf32> to vector<1x1xf32>
    %38 = arith.addf %34, %37 : vector<1x1xf32>
    %c0_18 = arith.constant 0 : index
    %c0_19 = arith.constant 0 : index
    %39 = vector.load %arg8[%c0_18, %c0_19] : memref<1x1xf32, #tpu.memory_space<vmem>>, vector<1x1xf32>
    tpu.vector_store %arg8[%c0_18, %c0_19], %38 {strides = array<i32>} : memref<1x1xf32, #tpu.memory_space<vmem>>, vector<1x1xf32>,
    %c0_20 = arith.constant 0 : index
    %c0_21 = arith.constant 0 : index
    %40 = vector.load %arg9[%c0_20, %c0_21] : memref<1x1xf32, #tpu.memory_space<vmem>>, vector<1x1xf32>
    %cst_22 = arith.constant dense<0.000000e+00> : vector<1xf32>
    %41 = vector.multi_reduction <add>, %33, %cst_22 [0] : vector<4x1xf32> to vector<1xf32>
    %42 = vector.shape_cast %41 : vector<1xf32> to vector<1x1xf32>
    %43 = arith.addf %40, %42 : vector<1x1xf32>
    %c0_23 = arith.constant 0 : index
    %c0_24 = arith.constant 0 : index
    %44 = vector.load %arg9[%c0_23, %c0_24] : memref<1x1xf32, #tpu.memory_space<vmem>>, vector<1x1xf32>
    tpu.vector_store %arg9[%c0_23, %c0_24], %43 {strides = array<i32>} : memref<1x1xf32, #tpu.memory_space<vmem>>, vector<1x1xf32>,
    %c0_i32_25 = arith.constant 0 : i32
    %45 = arith.cmpi eq, %arg1, %c0_i32_25 : i32
    %46 = arith.extui %45 : i1 to i32
    %c0_i32_26 = arith.constant 0 : i32
    %47 = arith.cmpi ne, %46, %c0_i32_26 : i32
    scf.if %47 {
      %c0_27 = arith.constant 0 : index
      %c0_28 = arith.constant 0 : index
      %48 = vector.load %arg8[%c0_27, %c0_28] : memref<1x1xf32, #tpu.memory_space<vmem>>, vector<1x1xf32>
      %c0_29 = arith.constant 0 : index
      %c0_30 = arith.constant 0 : index
      %49 = vector.load %arg9[%c0_29, %c0_30] : memref<1x1xf32, #tpu.memory_space<vmem>>, vector<1x1xf32>
      %50 = tpu.reciprocal %49 {approx = true} : vector<1x1xf32> -> vector<1x1xf32>
      %51 = arith.mulf %48, %50 : vector<1x1xf32>
      %52 = vector.shape_cast %51 : vector<1x1xf32> to vector<1x1x1xf32>
      %c0_31 = arith.constant 0 : index
      %c0_32 = arith.constant 0 : index
      %c0_33 = arith.constant 0 : index
      %53 = vector.load %arg7[%c0_31, %c0_32, %c0_33] : memref<1x1x1xf32, #tpu.memory_space<vmem>>, vector<1x1x1xf32>
      tpu.vector_store %arg7[%c0_31, %c0_32, %c0_33], %52 {strides = array<i32>} : memref<1x1x1xf32, #tpu.memory_space<vmem>>, vector<1x1x1xf32>,
    } else {
    }
    return
  }
  func.func @transform_0(%arg0: i32, %arg1: i32) -> (i32, i32, i32) {
    %c0_i32 = arith.constant 0 : i32
    %c0_i32_0 = arith.constant 0 : i32
    return %arg0, %arg1, %c0_i32 : i32, i32, i32
  }
  func.func @transform_1(%arg0: i32, %arg1: i32) -> (i32, i32) {
    %c0_i32 = arith.constant 0 : i32
    %c0_i32_0 = arith.constant 0 : i32
    %c0_i32_1 = arith.constant 0 : i32
    return %c0_i32, %c0_i32_0 : i32, i32
  }
  func.func @transform_2(%arg0: i32, %arg1: i32) -> (i32, i32) {
    %c0_i32 = arith.constant 0 : i32
    %c0_i32_0 = arith.constant 0 : i32
    %c0_i32_1 = arith.constant 0 : i32
    return %c0_i32, %c0_i32_0 : i32, i32
  }
  func.func @transform_3(%arg0: i32, %arg1: i32) -> (i32, i32) {
    %c0_i32 = arith.constant 0 : i32
    %c0_i32_0 = arith.constant 0 : i32
    %c0_i32_1 = arith.constant 0 : i32
    return %c0_i32, %c0_i32_0 : i32, i32
  }
  func.func @transform_4(%arg0: i32, %arg1: i32) -> i32 {
    %c0_i32 = arith.constant 0 : i32
    %c0_i32_0 = arith.constant 0 : i32
    return %c0_i32 : i32
  }
  func.func @transform_5(%arg0: i32, %arg1: i32) -> (i32, i32, i32) {
    %c0_i32 = arith.constant 0 : i32
    %c0_i32_0 = arith.constant 0 : i32
    %c0_i32_1 = arith.constant 0 : i32
    return %arg0, %c0_i32, %c0_i32_0 : i32, i32, i32
  }
}

</mosaic_0001>

<bundles_post_ra>
// kernel: cpnet_forward.1
= control target key start
LH: loop header
LB: loop body
LE: loop exit
PB: predicated region body
PF: predicated region fallthrough
CT: control target
= control target key end

     0   :  { %10 = vsyncpa [#allocation5], 0  ;;  %s6381_s18 = smov 0   ;;  %s6383_s19 = smov 0   ;;  %s8309_s0 = inlined_call_operand.vmem [shape: bf16[2,4,1536], index: 0, kind: input, shape index: {}]   ;;  %s8310_s1 = inlined_call_operand.vmem [shape: bf16[1536,768], index: 1, kind: input, shape index: {}]   ;;  %s8311_s2 = inlined_call_operand.vmem [shape: f32[1,768], index: 2, kind: input, shape index: {}]   ;;  %s8312_s3 = inlined_call_operand.vmem [shape: f32[1,768], index: 3, kind: input, shape index: {}]   ;;  %s8313_s4 = inlined_call_operand.vmem [shape: f32[2], index: 4, kind: input, shape index: {}]   ;;  %s8314_s5 = inlined_call_operand.vmem [shape: f32[2,1,1], index: 5, kind: output, shape index: {}]  }
   0x1   :  { %s6385_s20 = smov 0  }
   0x2 LB: > { %s4742_s21 = sadd.s32 4294967295, %s6346_s20   ;;  %s28_s22 = sadd.s32 1, %s6342_s19  ;;  %s6346_s20 = sphi %s6385_s20, %s16_s20   ;;  %s6342_s19 = sphi %s6383_s19, %s8318_s19   ;;  %s6338_s18 = sphi %s6381_s18, %s8317_s18  }
   0x3   : > { %p30_p0 = scmp.ge.s32.totalorder %s28_s22, 2  ;;  %p4744_p1 = scmp.ge.s32.totalorder %s6346_s20, 1 }
   0x4   : > { %p171_p2 = scmp.lt.s32.totalorder %s6346_s20, 3  ;;  %p6406_p4 = scmp.eq.s32.totalorder %s4742_s21, 0 }
   0x5   : > { %s8320_s22 = smov (%p30_p0, %s28_s22), 0  ;;  %s193_s27 = sshll.u32 %s8313_s4, 4  ;;  %s194_s27 = int_to_ptr.vmem [resolvable:$true] %s193_s27 }
   0x6   : > { %p6402_p3 = pnand %p4744_p1, %p171_p2  ;;  %s6305_s28 = scalar_lea.vmem %s194_s27, 16 }
   0x7   : > { %p6306_p7 = scmp.ne.s32.totalorder %s194_s27, %s6305_s28  ;;  %p6313_p11 = scmp.lt.s32.totalorder %s194_s27, %s194_s27 }
   0x8   : > { %p5399_p5 = pneg %p6402_p3  ;;  %p6314_p12 = scmp.lt.s32.totalorder %s6305_s28, %s6305_s28 }
   0xa   : > { %p5400_p6 = pnand %p6406_p4, %p5399_p5  ;;  %p6315_p13 = por %p6314_p12, %p6313_p11 }
   0xc   : > { %p6307_p8 = pneg %p5400_p6 }
   0xe   : > { %p6308_p9 = pnand %p6307_p8, %p6306_p7 }
  0x10   : > { %p6309_p10 = pneg %p6308_p9 }
  0x12   : > { %p6316_p0 = pnand %p6315_p13, %p6309_p10 }
  0x14   : > { %6319 = shalt.err (!%p6316_p0)
}
  0x15   : > { %s6348_s29 = smov [#allocation4]   ;;  %218 = sbr.rel (%p6402_p3) target bundleno = 1039 (0x40f), region = 40 }
  0x16   : > { %5402 = dma.vmem_to_smem (!%p5400_p6), %s194_s27, 16, %s6348_s29, [#allocation5]  }
  0x1c   : > { %6333 = dma.done.wait (%p6406_p4), [#allocation5], 16  }
  0x1d   : > { %6335 = vsyncadd (%p6406_p4), [#allocation5], 4294967280 }
  0x1e   : > { %224 = sfence }
  0x1f   : > { %v5432_v0 = vld [vmem:[%s8310_s1 + $0x4] ss:$24 sps:$4 sm:$0xff]   ;;  %v5436_v2 = vld [vmem:[%s8310_s1] ss:$24 sps:$4 sm:$0xff]   ;;  %v5438_v4 = vld [vmem:[%s8310_s1 + $0x34] ss:$24 sps:$4 sm:$0xff]   ;;  %v849_v36 = vlaneseq }
  0x20   : > { %v5434_v1 = vld [vmem:[%s8310_s1 + $0x904] ss:$24 sps:$4 sm:$0xff]   ;;  %3825 = vmatprep.subr.bf16.mxu1 %v5432_v0  ;;  %v5437_v3 = vld [vmem:[%s8310_s1 + $0x900] ss:$24 sps:$4 sm:$0xff]   ;;  %v5440_v5 = vld [vmem:[%s8310_s1 + $0x934] ss:$24 sps:$4 sm:$0xff]  }
  0x21   : > { %3948 = vmatprep.subr.bf16.mxu0 %v5434_v1  ;;  %3826 = vmatpush1.bf16.msra.mxu1 %v5436_v2  ;;  %v5442_v6 = vld [vmem:[%s8310_s1 + $0x30] ss:$24 sps:$4 sm:$0xff]   ;;  %v5444_v8 = vld [vmem:[%s8310_s1 + $0x64] ss:$24 sps:$4 sm:$0xff]   ;;  %v5448_v10 = vld [vmem:[%s8310_s1 + $0x60] ss:$24 sps:$4 sm:$0xff]  }
  0x22   : > { %3949 = vmatpush1.bf16.msra.mxu0 %v5437_v3  ;;  %3827 = vmatprep.subr.bf16.mxu1 %v5438_v4  ;;  %v5443_v7 = vld [vmem:[%s8310_s1 + $0x930] ss:$24 sps:$4 sm:$0xff]   ;;  %v5446_v9 = vld [vmem:[%s8310_s1 + $0x964] ss:$24 sps:$4 sm:$0xff]   ;;  %v5449_v11 = vld [vmem:[%s8310_s1 + $0x960] ss:$24 sps:$4 sm:$0xff]  }
  0x23   : > { %3950 = vmatprep.subr.bf16.mxu0 %v5440_v5  ;;  %v5450_v12 = vld [vmem:[%s8310_s1 + $0x94] ss:$24 sps:$4 sm:$0xff]   ;;  %v5454_v14 = vld [vmem:[%s8310_s1 + $0x90] ss:$24 sps:$4 sm:$0xff]   ;;  %v5456_v16 = vld [vmem:[%s8310_s1 + $0xc4] ss:$24 sps:$4 sm:$0xff]  }
  0x24   : > { %v5452_v13 = vld [vmem:[%s8310_s1 + $0x994] ss:$24 sps:$4 sm:$0xff]   ;;  %v5455_v15 = vld [vmem:[%s8310_s1 + $0x990] ss:$24 sps:$4 sm:$0xff]   ;;  %v5458_v17 = vld [vmem:[%s8310_s1 + $0x9c4] ss:$24 sps:$4 sm:$0xff]  }
  0x25   : > { %3828 = vmatpush1.bf16.msra.mxu1 %v5442_v6  ;;  %v5460_v18 = vld [vmem:[%s8310_s1 + $0xc0] ss:$24 sps:$4 sm:$0xff]   ;;  %v5462_v20 = vld [vmem:[%s8310_s1 + $0xf4] ss:$24 sps:$4 sm:$0xff]   ;;  %v5466_v22 = vld [vmem:[%s8310_s1 + $0xf0] ss:$24 sps:$4 sm:$0xff]  }
  0x26   : > { %3951 = vmatpush1.bf16.msra.mxu0 %v5443_v7  ;;  %3829 = vmatprep.subr.bf16.mxu1 %v5444_v8  ;;  %v5461_v19 = vld [vmem:[%s8310_s1 + $0x9c0] ss:$24 sps:$4 sm:$0xff]   ;;  %v5464_v21 = vld [vmem:[%s8310_s1 + $0x9f4] ss:$24 sps:$4 sm:$0xff]   ;;  %v5467_v23 = vld [vmem:[%s8310_s1 + $0x9f0] ss:$24 sps:$4 sm:$0xff]  }
  0x27   : > { %3952 = vmatprep.subr.bf16.mxu0 %v5446_v9  ;;  %v5468_v24 = vld [vmem:[%s8310_s1 + $0x124] ss:$24 sps:$4 sm:$0xff]   ;;  %v5472_v26 = vld [vmem:[%s8310_s1 + $0x120] ss:$24 sps:$4 sm:$0xff]   ;;  %v5474_v28 = vld [vmem:[%s8310_s1 + $0x154] ss:$24 sps:$4 sm:$0xff]  }
  0x28   : > { %v5470_v25 = vld [vmem:[%s8310_s1 + $0xa24] ss:$24 sps:$4 sm:$0xff]   ;;  %v5473_v27 = vld [vmem:[%s8310_s1 + $0xa20] ss:$24 sps:$4 sm:$0xff]   ;;  %v5476_v29 = vld [vmem:[%s8310_s1 + $0xa54] ss:$24 sps:$4 sm:$0xff]  }
  0x29   : > { %3830 = vmatpush1.bf16.msra.mxu1 %v5448_v10  ;;  %v5478_v30 = vld [vmem:[%s8310_s1 + $0x150] ss:$24 sps:$4 sm:$0xff]   ;;  %v5480_v32 = vld [vmem:[%s8310_s1 + $0x184] ss:$24 sps:$4 sm:$0xff]   ;;  %p249_p1 = scmp.lt.s32.totalorder %s6338_s18, 1  ;;  %v6544_v42 = vshrl.u32 %v849_v36, 7 }
  0x2a   : > { %3953 = vmatpush1.bf16.msra.mxu0 %v5449_v11  ;;  %3831 = vmatprep.subr.bf16.mxu1 %v5450_v12  ;;  %v5479_v31 = vld [vmem:[%s8310_s1 + $0xa50] ss:$24 sps:$4 sm:$0xff]   ;;  %v5482_v33 = vld [vmem:[%s8310_s1 + $0xa84] ss:$24 sps:$4 sm:$0xff]   ;;  %v5484_v34 = vld [vmem:[%s8310_s1 + $0x180] ss:$24 sps:$4 sm:$0xff]  }
  0x2b   : > { %3954 = vmatprep.subr.bf16.mxu0 %v5452_v13  ;;  %v5485_v35 = vld [vmem:[%s8310_s1 + $0xa80] ss:$24 sps:$4 sm:$0xff]   ;;  %v6349_v37 = vmov 1983009808   ;;  %v5486_v39 = vld [vmem:[%s8310_s1 + $0x1b4] ss:$24 sps:$4 sm:$0xff]  }
  0x2c   : > { %v884_v38 = vunpack.c.l.s4 %v6349_v37  ;;  %v5488_v40 = vld [vmem:[%s8310_s1 + $0xab4] ss:$24 sps:$4 sm:$0xff]   ;;  %s8322_s18 = smov (!%p249_p1, %s6338_s18), 1  ;;  %v5490_v41 = vld [vmem:[%s8310_s1 + $0x1b0] ss:$24 sps:$4 sm:$0xff]   ;;  %vm4607_vm0 = vcmask 1043456  }
  0x2d   : > { %3832 = vmatpush1.bf16.msra.mxu1 %v5454_v14  ;;  %v5491_v44 = vld [vmem:[%s8310_s1 + $0xab0] ss:$24 sps:$4 sm:$0xff]   ;;  %v5492_v45 = vld [vmem:[%s8310_s1 + $0x1e4] ss:$24 sps:$4 sm:$0xff]   ;;  %s5394_s30 = smul.u32 24, %s8322_s18  ;;  %vm265_vm1 = vcmask 0   ;;  %s260_s21 = scalar_lea.vmem %s8314_s5, %s8322_s18 }
  0x2e   : > { %3955 = vmatpush1.bf16.msra.mxu0 %v5455_v15  ;;  %3833 = vmatprep.subr.bf16.mxu1 %v5456_v16  ;;  %v885_v43 = vunpack.c.0.s8 %v884_v38  ;;  %v5494_v46 = vld [vmem:[%s8310_s1 + $0xae4] ss:$24 sps:$4 sm:$0xff]   ;;  %v5496_v47 = vld [vmem:[%s8310_s1 + $0x1e0] ss:$24 sps:$4 sm:$0xff]   ;;  %v5498_v50 = vld [vmem:[%s8310_s1 + $0x214] ss:$24 sps:$4 sm:$0xff]  }
  0x2f   : > { %3956 = vmatprep.subr.bf16.mxu0 %v5458_v17  ;;  %v5497_v48 = vld [vmem:[%s8310_s1 + $0xae0] ss:$24 sps:$4 sm:$0xff]   ;;  %v5500_v51 = vld [vmem:[%s8310_s1 + $0xb14] ss:$24 sps:$4 sm:$0xff]   ;;  %s6574_s16 = scalar_lea.vmem %s8309_s0, %s5394_s30  ;;  %v5502_v53 = vld [vmem:[%s8310_s1 + $0x210] ss:$24 sps:$4 sm:$0xff]  }
  0x30   : > { %v6563_v49 = vsub.s32 %v885_v43, %v6544_v42  ;;  %v268_v52 = vld [vmem:[%s6574_s16] sm:$0xff]  ;;  %v5503_v55 = vld [vmem:[%s8310_s1 + $0xb10] ss:$24 sps:$4 sm:$0xff]   ;;  %v5510_v0 = vld [vmem:[%s8310_s1 + $0x274] ss:$24 sps:$4 sm:$0xff]   ;;  %s5326_s13 = sld [smem:[#allocation4 + $0x1]] }
  0x31   : > { %3834 = vmatpush1.bf16.msra.mxu1 %v5460_v18  ;;  %v269_v56 = vld [vmem:[%s6574_s16 + $0x8] sm:$0xff]  ;;  %v5504_v57 = vld [vmem:[%s8310_s1 + $0x244] ss:$24 sps:$4 sm:$0xff]   ;;  %v5508_v62 = vld [vmem:[%s8310_s1 + $0x240] ss:$24 sps:$4 sm:$0xff]   ;;  %v882_v11 = vcombine.high %v268_v52, %v268_v52  ;;  %s4615_s14 = sld [smem:[#allocation4]] }
  0x32   : > { %3957 = vmatpush1.bf16.msra.mxu0 %v5461_v19  ;;  %3835 = vmatprep.subr.bf16.mxu1 %v5462_v20  ;;  %v6581_v54 = vrot.slane %v268_v52, %v6563_v49  ;;  %v5506_v58 = vld [vmem:[%s8310_s1 + $0xb44] ss:$24 sps:$4 sm:$0xff]   ;;  %v899_v60 = vcombine.high %v269_v56, %v269_v56  ;;  %v5509_v63 = vld [vmem:[%s8310_s1 + $0xb40] ss:$24 sps:$4 sm:$0xff]   ;;  %v5512_v1 = vld [vmem:[%s8310_s1 + $0xb74] ss:$24 sps:$4 sm:$0xff]   ;;  %v6658_v17 = vrot.slane %v269_v56, %v6563_v49 }
  0x33   : > { %3958 = vmatprep.subr.bf16.mxu0 %v5464_v21  ;;  %v5514_v3 = vld [vmem:[%s8310_s1 + $0x270] ss:$24 sps:$4 sm:$0xff]   ;;  %v5516_v5 = vld [vmem:[%s8310_s1 + $0x2a4] ss:$24 sps:$4 sm:$0xff]   ;;  %v5520_v7 = vld [vmem:[%s8310_s1 + $0x2a0] ss:$24 sps:$4 sm:$0xff]   ;;  %v6655_v16 = vrot.slane %v882_v11, %v6563_v49 }
  0x34   : > { %v6595_v59 = vcombine.high %v6581_v54, %v6581_v54  ;;  %v6599_v61 = vrot.slane %v899_v60, %v6563_v49  ;;  %v5515_v4 = vld [vmem:[%s8310_s1 + $0xb70] ss:$24 sps:$4 sm:$0xff]   ;;  %v5518_v6 = vld [vmem:[%s8310_s1 + $0xba4] ss:$24 sps:$4 sm:$0xff]   ;;  %v5521_v8 = vld [vmem:[%s8310_s1 + $0xba0] ss:$24 sps:$4 sm:$0xff]  }
  0x35   : > { %3836 = vmatpush1.bf16.msra.mxu1 %v5466_v22  ;;  %v5522_v9 = vld [vmem:[%s8310_s1 + $0x2d4] ss:$24 sps:$4 sm:$0xff]   ;;  %v5526_v12 = vld [vmem:[%s8310_s1 + $0x2d0] ss:$24 sps:$4 sm:$0xff]   ;;  %v5530_v14 = vld [vmem:[%s8310_s1 + $0x304] ss:$24 sps:$4 sm:$0xff]   ;;  %v6674_v22 = vcombine.high %v6655_v16, %v6655_v16 }
  0x36   : > { %3959 = vmatpush1.bf16.msra.mxu0 %v5467_v23  ;;  %3837 = vmatprep.subr.bf16.mxu1 %v5468_v24  ;;  %v6615_v2 = vcombine.high %v6599_v61, %v6599_v61  ;;  %v5524_v10 = vld [vmem:[%s8310_s1 + $0xbd4] ss:$24 sps:$4 sm:$0xff]   ;;  %v5527_v13 = vld [vmem:[%s8310_s1 + $0xbd0] ss:$24 sps:$4 sm:$0xff]   ;;  %v5534_v15 = vld [vmem:[%s8310_s1 + $0xc04] ss:$24 sps:$4 sm:$0xff]  }
  0x37   : > { %3960 = vmatprep.subr.bf16.mxu0 %v5470_v25  ;;  %3857 = vmatprep.mubr.bf16.mxu1 %v6595_v59  ;;  %v5528_v18 = vld [vmem:[%s8310_s1 + $0x300] ss:$24 sps:$4 sm:$0xff]   ;;  %v5537_v20 = vld [vmem:[%s8310_s1 + $0x334] ss:$24 sps:$4 sm:$0xff]   ;;  %v5535_v23 = vld [vmem:[%s8310_s1 + $0x330] ss:$24 sps:$4 sm:$0xff]  }
  0x38   : > { %3980 = vmatprep.mubr.bf16.mxu0 %v6615_v2  ;;  %v5532_v19 = vld [vmem:[%s8310_s1 + $0xc00] ss:$24 sps:$4 sm:$0xff]   ;;  %v5540_v21 = vld [vmem:[%s8310_s1 + $0xc34] ss:$24 sps:$4 sm:$0xff]   ;;  %v5538_v24 = vld [vmem:[%s8310_s1 + $0xc30] ss:$24 sps:$4 sm:$0xff]  }
  0x39   : > { %3838 = vmatpush1.bf16.msra.mxu1 %v5472_v26  ;;  %v5543_v25 = vld [vmem:[%s8310_s1 + $0x364] ss:$24 sps:$4 sm:$0xff]   ;;  %v5556_v36 = vld [vmem:[%s8310_s1 + $0xcc0] ss:$24 sps:$4 sm:$0xff]   ;;  %v5561_v37 = vld [vmem:[%s8310_s1 + $0x3f4] ss:$24 sps:$4 sm:$0xff]  }
  0x3a   : > { %3961 = vmatpush1.bf16.msra.mxu0 %v5473_v27  ;;  %3839 = vmatprep.subr.bf16.mxu1 %v5474_v28  ;;  %v5546_v26 = vld [vmem:[%s8310_s1 + $0xc64] ss:$24 sps:$4 sm:$0xff]   ;;  %v5541_v27 = vld [vmem:[%s8310_s1 + $0x360] ss:$24 sps:$4 sm:$0xff]   ;;  %v5564_v38 = vld [vmem:[%s8310_s1 + $0xcf4] ss:$24 sps:$4 sm:$0xff]  }
  0x3b   : > { %3962 = vmatprep.subr.bf16.mxu0 %v5476_v29  ;;  %v5544_v28 = vld [vmem:[%s8310_s1 + $0xc60] ss:$24 sps:$4 sm:$0xff]   ;;  %v5549_v29 = vld [vmem:[%s8310_s1 + $0x394] ss:$24 sps:$4 sm:$0xff]   ;;  %v5570_v43 = vld [vmem:[%s8310_s1 + $0xd24] ss:$24 sps:$4 sm:$0xff]  }
  0x3c   : > { %v5571_v52 = vld [vmem:[%s8310_s1 + $0x450] ss:$24 sps:$4 sm:$0xff]   ;;  %v5582_v56 = vld [vmem:[%s8310_s1 + $0xd84] ss:$24 sps:$4 sm:$0xff]   ;;  %v5585_v60 = vld [vmem:[%s8310_s1 + $0x4b4] ss:$24 sps:$4 sm:$0xff]  }
  0x3d   : > { %3840 = vmatpush1.bf16.msra.mxu1 %v5478_v30  ;;  %v5552_v30 = vld [vmem:[%s8310_s1 + $0xc94] ss:$24 sps:$4 sm:$0xff]   ;;  %v5606_v11 = vld [vmem:[%s8310_s1 + $0xe44] ss:$24 sps:$4 sm:$0xff]  }
  0x3e   : > { %3963 = vmatpush1.bf16.msra.mxu0 %v5479_v31  ;;  %3841 = vmatprep.subr.bf16.mxu1 %v5480_v32  ;;  %v5547_v31 = vld [vmem:[%s8310_s1 + $0x390] ss:$24 sps:$4 sm:$0xff]  }
  0x3f   : > { %3964 = vmatprep.subr.bf16.mxu0 %v5482_v33  ;;  %v5550_v32 = vld [vmem:[%s8310_s1 + $0xc90] ss:$24 sps:$4 sm:$0xff]   ;;  %v5555_v33 = vld [vmem:[%s8310_s1 + $0x3c4] ss:$24 sps:$4 sm:$0xff]  }
  0x41   : > { %3842 = vmatpush1.bf16.msra.mxu1 %v5484_v34  ;;  %v5558_v34 = vld [vmem:[%s8310_s1 + $0xcc4] ss:$24 sps:$4 sm:$0xff]  }
  0x42   : > { %3965 = vmatpush1.bf16.msra.mxu0 %v5485_v35  ;;  %3843 = vmatprep.subr.bf16.mxu1 %v5486_v39  ;;  %v5553_v35 = vld [vmem:[%s8310_s1 + $0x3c0] ss:$24 sps:$4 sm:$0xff]   ;;  %v5559_v39 = vld [vmem:[%s8310_s1 + $0x3f0] ss:$24 sps:$4 sm:$0xff]  }
  0x43   : > { %3966 = vmatprep.subr.bf16.mxu0 %v5488_v40  ;;  %v5562_v40 = vld [vmem:[%s8310_s1 + $0xcf0] ss:$24 sps:$4 sm:$0xff]  }
  0x45   : > { %3844 = vmatpush1.bf16.msra.mxu1 %v5490_v41  ;;  %v5567_v41 = vld [vmem:[%s8310_s1 + $0x424] ss:$24 sps:$4 sm:$0xff]  }
  0x46   : > { %3967 = vmatpush1.bf16.msra.mxu0 %v5491_v44  ;;  %3845 = vmatprep.subr.bf16.mxu1 %v5492_v45  ;;  %v5565_v44 = vld [vmem:[%s8310_s1 + $0x420] ss:$24 sps:$4 sm:$0xff]   ;;  %v6743_v45 = vld [vmem:[%s6574_s16 + $0x10] sm:$0xff] }
  0x47   : > { %3968 = vmatprep.subr.bf16.mxu0 %v5494_v46  ;;  %v5568_v46 = vld [vmem:[%s8310_s1 + $0xd20] ss:$24 sps:$4 sm:$0xff]  }
  0x49   : > { %3846 = vmatpush1.bf16.msra.mxu1 %v5496_v47  ;;  %v5573_v47 = vld [vmem:[%s8310_s1 + $0x454] ss:$24 sps:$4 sm:$0xff]  }
  0x4a   : > { %3969 = vmatpush1.bf16.msra.mxu0 %v5497_v48  ;;  %3847 = vmatprep.subr.bf16.mxu1 %v5498_v50  ;;  %v6753_v48 = vrot.slane %v6743_v45, %v6563_v49  ;;  %v5576_v50 = vld [vmem:[%s8310_s1 + $0xd54] ss:$24 sps:$4 sm:$0xff]  }
  0x4b   : > { %3970 = vmatprep.subr.bf16.mxu0 %v5500_v51 }
  0x4c   : > { %v6760_v51 = vcombine.high %v6753_v48, %v6753_v48 }
  0x4d   : > { %3848 = vmatpush1.bf16.msra.mxu1 %v5502_v53  ;;  %v5574_v53 = vld [vmem:[%s8310_s1 + $0xd50] ss:$24 sps:$4 sm:$0xff]  }
  0x4e   : > { %3971 = vmatpush1.bf16.msra.mxu0 %v5503_v55  ;;  %3849 = vmatprep.subr.bf16.mxu1 %v5504_v57  ;;  %v5579_v55 = vld [vmem:[%s8310_s1 + $0x484] ss:$24 sps:$4 sm:$0xff]   ;;  %v5577_v57 = vld [vmem:[%s8310_s1 + $0x480] ss:$24 sps:$4 sm:$0xff]  }
  0x4f   : > { %3972 = vmatprep.subr.bf16.mxu0 %v5506_v58  ;;  %v5580_v58 = vld [vmem:[%s8310_s1 + $0xd80] ss:$24 sps:$4 sm:$0xff]  }
  0x51   : > { %3850 = vmatpush1.bf16.msra.mxu1 %v5508_v62  ;;  %v5588_v62 = vld [vmem:[%s8310_s1 + $0xdb4] ss:$24 sps:$4 sm:$0xff]  }
  0x52   : > { %3973 = vmatpush1.bf16.msra.mxu0 %v5509_v63  ;;  %3851 = vmatprep.subr.bf16.mxu1 %v5510_v0  ;;  %v5583_v63 = vld [vmem:[%s8310_s1 + $0x4b0] ss:$24 sps:$4 sm:$0xff]  }
  0x53   : > { %3974 = vmatprep.subr.bf16.mxu0 %v5512_v1  ;;  %v5586_v0 = vld [vmem:[%s8310_s1 + $0xdb0] ss:$24 sps:$4 sm:$0xff]   ;;  %v5591_v1 = vld [vmem:[%s8310_s1 + $0x4e4] ss:$24 sps:$4 sm:$0xff]  }
  0x55   : > { %3852 = vmatpush1.bf16.msra.mxu1 %v5514_v3  ;;  %v5594_v3 = vld [vmem:[%s8310_s1 + $0xde4] ss:$24 sps:$4 sm:$0xff]  }
  0x56   : > { %3975 = vmatpush1.bf16.msra.mxu0 %v5515_v4  ;;  %3853 = vmatprep.subr.bf16.mxu1 %v5516_v5  ;;  %v5589_v4 = vld [vmem:[%s8310_s1 + $0x4e0] ss:$24 sps:$4 sm:$0xff]  }
  0x57   : > { %3976 = vmatprep.subr.bf16.mxu0 %v5518_v6  ;;  %v5592_v5 = vld [vmem:[%s8310_s1 + $0xde0] ss:$24 sps:$4 sm:$0xff]   ;;  %v5597_v6 = vld [vmem:[%s8310_s1 + $0x514] ss:$24 sps:$4 sm:$0xff]  }
  0x59   : > { %3854 = vmatpush1.bf16.msra.mxu1 %v5520_v7  ;;  %v5600_v7 = vld [vmem:[%s8310_s1 + $0xe14] ss:$24 sps:$4 sm:$0xff]  }
  0x5a   : > { %3977 = vmatpush1.bf16.msra.mxu0 %v5521_v8  ;;  %3855 = vmatprep.subr.bf16.mxu1 %v5522_v9  ;;  %v5595_v8 = vld [vmem:[%s8310_s1 + $0x510] ss:$24 sps:$4 sm:$0xff]  }
  0x5b   : > { %3978 = vmatprep.subr.bf16.mxu0 %v5524_v10  ;;  %v5598_v9 = vld [vmem:[%s8310_s1 + $0xe10] ss:$24 sps:$4 sm:$0xff]   ;;  %v5603_v10 = vld [vmem:[%s8310_s1 + $0x544] ss:$24 sps:$4 sm:$0xff]  }
  0x5d   : > { %3856 = vmatpush1.bf16.msra.mxu1 %v5526_v12  ;;  %v5601_v12 = vld [vmem:[%s8310_s1 + $0x540] ss:$24 sps:$4 sm:$0xff]  }
  0x5e   : > { %3979 = vmatpush1.bf16.msra.mxu0 %v5527_v13  ;;  %3866 = vmatprep.subr.bf16.mxu1 %v5530_v14  ;;  %v5604_v13 = vld [vmem:[%s8310_s1 + $0xe40] ss:$24 sps:$4 sm:$0xff]   ;;  %v5609_v14 = vld [vmem:[%s8310_s1 + $0x574] ss:$24 sps:$4 sm:$0xff]  }
  0x5f   : > { %3989 = vmatprep.subr.bf16.mxu0 %v5534_v15  ;;  %v5612_v15 = vld [vmem:[%s8310_s1 + $0xe74] ss:$24 sps:$4 sm:$0xff]  }
  0x60   : > { %3858 = vmatmul.mubr.bf16.vlgmr.msra.gmra.mrb[0].mxu1 %v6581_v54 }
  0x61   : > { %3981 = vmatmul.mubr.bf16.vlgmr.msra.gmra.mrb[0].mxu0 %v6599_v61  ;;  %3867 = vmatpush1.bf16.msra.mxu1 %v5528_v18  ;;  %v5607_v18 = vld [vmem:[%s8310_s1 + $0x570] ss:$24 sps:$4 sm:$0xff]  }
  0x62   : > { %3990 = vmatpush1.bf16.msra.mxu0 %v5532_v19  ;;  %3868 = vmatprep.subr.bf16.mxu1 %v5537_v20  ;;  %v5610_v19 = vld [vmem:[%s8310_s1 + $0xe70] ss:$24 sps:$4 sm:$0xff]   ;;  %v5615_v20 = vld [vmem:[%s8310_s1 + $0x5a4] ss:$24 sps:$4 sm:$0xff]  }
  0x63   : > { %3991 = vmatprep.subr.bf16.mxu0 %v5540_v21  ;;  %3898 = vmatprep.mubr.bf16.mxu1 %v6674_v22  ;;  %v5618_v21 = vld [vmem:[%s8310_s1 + $0xea4] ss:$24 sps:$4 sm:$0xff]  }
  0x64   : > { %4021 = vmatprep.mubr.bf16.mxu0 %v6760_v51 }
  0x65   : > { %3869 = vmatpush1.bf16.msra.mxu1 %v5535_v23  ;;  %v5613_v23 = vld [vmem:[%s8310_s1 + $0x5a0] ss:$24 sps:$4 sm:$0xff]  }
  0x66   : > { %3992 = vmatpush1.bf16.msra.mxu0 %v5538_v24  ;;  %3870 = vmatprep.subr.bf16.mxu1 %v5543_v25  ;;  %v5616_v24 = vld [vmem:[%s8310_s1 + $0xea0] ss:$24 sps:$4 sm:$0xff]   ;;  %v5621_v25 = vld [vmem:[%s8310_s1 + $0x5d4] ss:$24 sps:$4 sm:$0xff]  }
  0x67   : > { %3993 = vmatprep.subr.bf16.mxu0 %v5546_v26  ;;  %v5624_v26 = vld [vmem:[%s8310_s1 + $0xed4] ss:$24 sps:$4 sm:$0xff]  }
  0x69   : > { %3871 = vmatpush1.bf16.msra.mxu1 %v5541_v27  ;;  %v916_v27 = vcombine.high %v6743_v45, %v6743_v45  ;;  %v5646_v45 = vld [vmem:[%s8310_s1 + $0x694] ss:$24 sps:$4 sm:$0xff]  }
  0x6a   : > { %3994 = vmatpush1.bf16.msra.mxu0 %v5544_v28  ;;  %3872 = vmatprep.subr.bf16.mxu1 %v5549_v29  ;;  %v5619_v28 = vld [vmem:[%s8310_s1 + $0x5d0] ss:$24 sps:$4 sm:$0xff]  }
  0x6b   : > { %3995 = vmatprep.subr.bf16.mxu0 %v5552_v30  ;;  %v5622_v29 = vld [vmem:[%s8310_s1 + $0xed0] ss:$24 sps:$4 sm:$0xff]   ;;  %v5628_v30 = vld [vmem:[%s8310_s1 + $0x604] ss:$24 sps:$4 sm:$0xff]  }
  0x6d   : > { %3873 = vmatpush1.bf16.msra.mxu1 %v5547_v31  ;;  %v5631_v31 = vld [vmem:[%s8310_s1 + $0xf04] ss:$24 sps:$4 sm:$0xff]  }
  0x6e   : > { %3996 = vmatpush1.bf16.msra.mxu0 %v5550_v32  ;;  %3874 = vmatprep.subr.bf16.mxu1 %v5555_v33  ;;  %v6874_v32 = vrot.slane %v916_v27, %v6563_v49  ;;  %v5626_v33 = vld [vmem:[%s8310_s1 + $0x600] ss:$24 sps:$4 sm:$0xff]   ;;  %v5637_v49 = vld [vmem:[%s8310_s1 + $0xf34] ss:$24 sps:$4 sm:$0xff]   ;;  %v5700_v27 = vld [vmem:[%s8310_s1 + $0x844] ss:$24 sps:$4 sm:$0xff]  }
  0x6f   : > { %3997 = vmatprep.subr.bf16.mxu0 %v5558_v34  ;;  %v5629_v34 = vld [vmem:[%s8310_s1 + $0xf00] ss:$24 sps:$4 sm:$0xff]  }
  0x71   : > { %3875 = vmatpush1.bf16.msra.mxu1 %v5553_v35  ;;  %v5634_v35 = vld [vmem:[%s8310_s1 + $0x634] ss:$24 sps:$4 sm:$0xff]  }
  0x72   : > { %3998 = vmatpush1.bf16.msra.mxu0 %v5556_v36  ;;  %3876 = vmatprep.subr.bf16.mxu1 %v5561_v37  ;;  %v6890_v36 = vcombine.high %v6658_v17, %v6658_v17  ;;  %v6894_v37 = vcombine.high %v6874_v32, %v6874_v32 }
  0x73   : > { %3999 = vmatprep.subr.bf16.mxu0 %v5564_v38  ;;  %v5632_v38 = vld [vmem:[%s8310_s1 + $0x630] ss:$24 sps:$4 sm:$0xff]  }
  0x75   : > { %3877 = vmatpush1.bf16.msra.mxu1 %v5559_v39  ;;  %v5635_v39 = vld [vmem:[%s8310_s1 + $0xf30] ss:$24 sps:$4 sm:$0xff]  }
  0x76   : > { %4000 = vmatpush1.bf16.msra.mxu0 %v5562_v40  ;;  %3878 = vmatprep.subr.bf16.mxu1 %v5567_v41  ;;  %v5640_v40 = vld [vmem:[%s8310_s1 + $0x664] ss:$24 sps:$4 sm:$0xff]  }
  0x77   : > { %4001 = vmatprep.subr.bf16.mxu0 %v5570_v43  ;;  %v5643_v41 = vld [vmem:[%s8310_s1 + $0xf64] ss:$24 sps:$4 sm:$0xff]   ;;  %v5638_v43 = vld [vmem:[%s8310_s1 + $0x660] ss:$24 sps:$4 sm:$0xff]  }
  0x79   : > { %3879 = vmatpush1.bf16.msra.mxu1 %v5565_v44  ;;  %v5641_v44 = vld [vmem:[%s8310_s1 + $0xf60] ss:$24 sps:$4 sm:$0xff]  }
  0x7a   : > { %4002 = vmatpush1.bf16.msra.mxu0 %v5568_v46  ;;  %3880 = vmatprep.subr.bf16.mxu1 %v5573_v47  ;;  %v5649_v46 = vld [vmem:[%s8310_s1 + $0xf94] ss:$24 sps:$4 sm:$0xff]   ;;  %v5644_v47 = vld [vmem:[%s8310_s1 + $0x690] ss:$24 sps:$4 sm:$0xff]  }
  0x7b   : > { %4003 = vmatprep.subr.bf16.mxu0 %v5576_v50  ;;  %v5647_v50 = vld [vmem:[%s8310_s1 + $0xf90] ss:$24 sps:$4 sm:$0xff]  }
  0x7d   : > { %3881 = vmatpush1.bf16.msra.mxu1 %v5571_v52  ;;  %v5652_v52 = vld [vmem:[%s8310_s1 + $0x6c4] ss:$24 sps:$4 sm:$0xff]  }
  0x7e   : > { %4004 = vmatpush1.bf16.msra.mxu0 %v5574_v53  ;;  %3882 = vmatprep.subr.bf16.mxu1 %v5579_v55  ;;  %v5655_v53 = vld [vmem:[%s8310_s1 + $0xfc4] ss:$24 sps:$4 sm:$0xff]   ;;  %v5650_v55 = vld [vmem:[%s8310_s1 + $0x6c0] ss:$24 sps:$4 sm:$0xff]  }
  0x7f   : > { %4005 = vmatprep.subr.bf16.mxu0 %v5582_v56  ;;  %v5653_v56 = vld [vmem:[%s8310_s1 + $0xfc0] ss:$24 sps:$4 sm:$0xff]  }
  0x81   : > { %3883 = vmatpush1.bf16.msra.mxu1 %v5577_v57  ;;  %v5658_v57 = vld [vmem:[%s8310_s1 + $0x6f4] ss:$24 sps:$4 sm:$0xff]  }
  0x82   : > { %4006 = vmatpush1.bf16.msra.mxu0 %v5580_v58  ;;  %3884 = vmatprep.subr.bf16.mxu1 %v5585_v60  ;;  %v5661_v58 = vld [vmem:[%s8310_s1 + $0xff4] ss:$24 sps:$4 sm:$0xff]   ;;  %v5656_v60 = vld [vmem:[%s8310_s1 + $0x6f0] ss:$24 sps:$4 sm:$0xff]  }
  0x83   : > { %4007 = vmatprep.subr.bf16.mxu0 %v5588_v62  ;;  %v5659_v62 = vld [vmem:[%s8310_s1 + $0xff0] ss:$24 sps:$4 sm:$0xff]  }
  0x85   : > { %3885 = vmatpush1.bf16.msra.mxu1 %v5583_v63  ;;  %v5664_v63 = vld [vmem:[%s8310_s1 + $0x724] ss:$24 sps:$4 sm:$0xff]  }
  0x86   : > { %4008 = vmatpush1.bf16.msra.mxu0 %v5586_v0  ;;  %3886 = vmatprep.subr.bf16.mxu1 %v5591_v1  ;;  %v5667_v0 = vld [vmem:[%s8310_s1 + $0x1024] ss:$24 sps:$4 sm:$0xff]   ;;  %v5662_v1 = vld [vmem:[%s8310_s1 + $0x720] ss:$24 sps:$4 sm:$0xff]  }
  0x87   : > { %4009 = vmatprep.subr.bf16.mxu0 %v5594_v3  ;;  %v5665_v3 = vld [vmem:[%s8310_s1 + $0x1020] ss:$24 sps:$4 sm:$0xff]  }
  0x89   : > { %3887 = vmatpush1.bf16.msra.mxu1 %v5589_v4  ;;  %v5670_v4 = vld [vmem:[%s8310_s1 + $0x754] ss:$24 sps:$4 sm:$0xff]  }
  0x8a   : > { %4010 = vmatpush1.bf16.msra.mxu0 %v5592_v5  ;;  %3888 = vmatprep.subr.bf16.mxu1 %v5597_v6  ;;  %v5673_v5 = vld [vmem:[%s8310_s1 + $0x1054] ss:$24 sps:$4 sm:$0xff]   ;;  %v5668_v6 = vld [vmem:[%s8310_s1 + $0x750] ss:$24 sps:$4 sm:$0xff]  }
  0x8b   : > { %4011 = vmatprep.subr.bf16.mxu0 %v5600_v7  ;;  %v5671_v7 = vld [vmem:[%s8310_s1 + $0x1050] ss:$24 sps:$4 sm:$0xff]  }
  0x8d   : > { %3889 = vmatpush1.bf16.msra.mxu1 %v5595_v8  ;;  %v5676_v8 = vld [vmem:[%s8310_s1 + $0x784] ss:$24 sps:$4 sm:$0xff]  }
  0x8e   : > { %4012 = vmatpush1.bf16.msra.mxu0 %v5598_v9  ;;  %3890 = vmatprep.subr.bf16.mxu1 %v5603_v10  ;;  %v5679_v9 = vld [vmem:[%s8310_s1 + $0x1084] ss:$24 sps:$4 sm:$0xff]   ;;  %v5674_v10 = vld [vmem:[%s8310_s1 + $0x780] ss:$24 sps:$4 sm:$0xff]  }
  0x8f   : > { %4013 = vmatprep.subr.bf16.mxu0 %v5606_v11  ;;  %v5677_v11 = vld [vmem:[%s8310_s1 + $0x1080] ss:$24 sps:$4 sm:$0xff]  }
  0x91   : > { %3891 = vmatpush1.bf16.msra.mxu1 %v5601_v12  ;;  %v5682_v12 = vld [vmem:[%s8310_s1 + $0x7b4] ss:$24 sps:$4 sm:$0xff]  }
  0x92   : > { %4014 = vmatpush1.bf16.msra.mxu0 %v5604_v13  ;;  %3892 = vmatprep.subr.bf16.mxu1 %v5609_v14  ;;  %v5685_v13 = vld [vmem:[%s8310_s1 + $0x10b4] ss:$24 sps:$4 sm:$0xff]   ;;  %v5680_v14 = vld [vmem:[%s8310_s1 + $0x7b0] ss:$24 sps:$4 sm:$0xff]  }
  0x93   : > { %4015 = vmatprep.subr.bf16.mxu0 %v5612_v15  ;;  %v5683_v15 = vld [vmem:[%s8310_s1 + $0x10b0] ss:$24 sps:$4 sm:$0xff]  }
  0x95   : > { %3893 = vmatpush1.bf16.msra.mxu1 %v5607_v18  ;;  %v5688_v18 = vld [vmem:[%s8310_s1 + $0x7e4] ss:$24 sps:$4 sm:$0xff]  }
  0x96   : > { %4016 = vmatpush1.bf16.msra.mxu0 %v5610_v19  ;;  %3894 = vmatprep.subr.bf16.mxu1 %v5615_v20  ;;  %v5691_v19 = vld [vmem:[%s8310_s1 + $0x10e4] ss:$24 sps:$4 sm:$0xff]   ;;  %v5686_v20 = vld [vmem:[%s8310_s1 + $0x7e0] ss:$24 sps:$4 sm:$0xff]  }
  0x97   : > { %4017 = vmatprep.subr.bf16.mxu0 %v5618_v21  ;;  %v5689_v21 = vld [vmem:[%s8310_s1 + $0x10e0] ss:$24 sps:$4 sm:$0xff]  }
  0x99   : > { %3895 = vmatpush1.bf16.msra.mxu1 %v5613_v23  ;;  %v5694_v23 = vld [vmem:[%s8310_s1 + $0x814] ss:$24 sps:$4 sm:$0xff]  }
  0x9a   : > { %4018 = vmatpush1.bf16.msra.mxu0 %v5616_v24  ;;  %3896 = vmatprep.subr.bf16.mxu1 %v5621_v25  ;;  %v5697_v24 = vld [vmem:[%s8310_s1 + $0x1114] ss:$24 sps:$4 sm:$0xff]   ;;  %v5692_v25 = vld [vmem:[%s8310_s1 + $0x810] ss:$24 sps:$4 sm:$0xff]  }
  0x9b   : > { %4019 = vmatprep.subr.bf16.mxu0 %v5624_v26  ;;  %v5695_v26 = vld [vmem:[%s8310_s1 + $0x1110] ss:$24 sps:$4 sm:$0xff]  }
  0x9d   : > { %3897 = vmatpush1.bf16.msra.mxu1 %v5619_v28  ;;  %v5703_v28 = vld [vmem:[%s8310_s1 + $0x1144] ss:$24 sps:$4 sm:$0xff]  }
  0x9e   : > { %4020 = vmatpush1.bf16.msra.mxu0 %v5622_v29  ;;  %3907 = vmatprep.subr.bf16.mxu1 %v5628_v30  ;;  %v5698_v29 = vld [vmem:[%s8310_s1 + $0x840] ss:$24 sps:$4 sm:$0xff]  }
  0x9f   : > { %4030 = vmatprep.subr.bf16.mxu0 %v5631_v31  ;;  %v5701_v30 = vld [vmem:[%s8310_s1 + $0x1140] ss:$24 sps:$4 sm:$0xff]   ;;  %v5706_v31 = vld [vmem:[%s8310_s1 + $0x874] ss:$24 sps:$4 sm:$0xff]  }
  0xa0   : > { %3899 = vmatmul.mubr.bf16.vlgmr.msra.gmra.mrb[0].mxu1 %v6655_v16 }
  0xa1   : > { %4022 = vmatmul.mubr.bf16.vlgmr.msra.gmra.mrb[0].mxu0 %v6753_v48  ;;  %3908 = vmatpush1.bf16.msra.mxu1 %v5626_v33  ;;  %v5709_v33 = vld [vmem:[%s8310_s1 + $0x1174] ss:$24 sps:$4 sm:$0xff]  }
  0xa2   : > { %4031 = vmatpush1.bf16.msra.mxu0 %v5629_v34  ;;  %3909 = vmatprep.subr.bf16.mxu1 %v5634_v35  ;;  %v5704_v34 = vld [vmem:[%s8310_s1 + $0x870] ss:$24 sps:$4 sm:$0xff]  }
  0xa3   : > { %4032 = vmatprep.subr.bf16.mxu0 %v5637_v49  ;;  %3939 = vmatprep.mubr.bf16.mxu1 %v6890_v36  ;;  %v5707_v35 = vld [vmem:[%s8310_s1 + $0x1170] ss:$24 sps:$4 sm:$0xff]   ;;  %v5712_v49 = vld [vmem:[%s8310_s1 + $0x8a4] ss:$24 sps:$4 sm:$0xff]  }
  0xa4   : > { %4062 = vmatprep.mubr.bf16.mxu0 %v6894_v37 }
  0xa5   : > { %3910 = vmatpush1.bf16.msra.mxu1 %v5632_v38  ;;  %v5715_v38 = vld [vmem:[%s8310_s1 + $0x11a4] ss:$24 sps:$4 sm:$0xff]  }
  0xa6   : > { %4033 = vmatpush1.bf16.msra.mxu0 %v5635_v39  ;;  %3911 = vmatprep.subr.bf16.mxu1 %v5640_v40  ;;  %v5710_v39 = vld [vmem:[%s8310_s1 + $0x8a0] ss:$24 sps:$4 sm:$0xff]  }
  0xa7   : > { %4034 = vmatprep.subr.bf16.mxu0 %v5643_v41  ;;  %v5713_v40 = vld [vmem:[%s8310_s1 + $0x11a0] ss:$24 sps:$4 sm:$0xff]   ;;  %v5718_v41 = vld [vmem:[%s8310_s1 + $0x8d4] ss:$24 sps:$4 sm:$0xff]  }
  0xa9   : > { %3912 = vmatpush1.bf16.msra.mxu1 %v5638_v43  ;;  %v5721_v43 = vld [vmem:[%s8310_s1 + $0x11d4] ss:$24 sps:$4 sm:$0xff]  }
  0xaa   : > { %4035 = vmatpush1.bf16.msra.mxu0 %v5641_v44  ;;  %3913 = vmatprep.subr.bf16.mxu1 %v5646_v45  ;;  %v5716_v44 = vld [vmem:[%s8310_s1 + $0x8d0] ss:$24 sps:$4 sm:$0xff]  }
  0xab   : > { %4036 = vmatprep.subr.bf16.mxu0 %v5649_v46  ;;  %v5719_v45 = vld [vmem:[%s8310_s1 + $0x11d0] ss:$24 sps:$4 sm:$0xff]   ;;  %v5725_v46 = vld [vmem:[%s8310_s1 + $0xc] ss:$24 sps:$4 sm:$0xff]  }
  0xad   : > { %3914 = vmatpush1.bf16.msra.mxu1 %v5644_v47  ;;  %v5728_v47 = vld [vmem:[%s8310_s1 + $0x14] ss:$24 sps:$4 sm:$0xff]  }
  0xae   : > { %4037 = vmatpush1.bf16.msra.mxu0 %v5647_v50  ;;  %3915 = vmatprep.subr.bf16.mxu1 %v5652_v52  ;;  %v5723_v50 = vld [vmem:[%s8310_s1 + $0x8] ss:$24 sps:$4 sm:$0xff]  }
  0xaf   : > { %4038 = vmatprep.subr.bf16.mxu0 %v5655_v53  ;;  %v5726_v52 = vld [vmem:[%s8310_s1 + $0x10] ss:$24 sps:$4 sm:$0xff]   ;;  %v5731_v53 = vld [vmem:[%s8310_s1 + $0x3c] ss:$24 sps:$4 sm:$0xff]  }
  0xb1   : > { %3916 = vmatpush1.bf16.msra.mxu1 %v5650_v55  ;;  %v5734_v55 = vld [vmem:[%s8310_s1 + $0x44] ss:$24 sps:$4 sm:$0xff]  }
  0xb2   : > { %4039 = vmatpush1.bf16.msra.mxu0 %v5653_v56  ;;  %3917 = vmatprep.subr.bf16.mxu1 %v5658_v57  ;;  %v5729_v56 = vld [vmem:[%s8310_s1 + $0x38] ss:$24 sps:$4 sm:$0xff]  }
  0xb3   : > { %4040 = vmatprep.subr.bf16.mxu0 %v5661_v58  ;;  %v5732_v57 = vld [vmem:[%s8310_s1 + $0x40] ss:$24 sps:$4 sm:$0xff]   ;;  %v5737_v58 = vld [vmem:[%s8310_s1 + $0x6c] ss:$24 sps:$4 sm:$0xff]  }
  0xb5   : > { %3918 = vmatpush1.bf16.msra.mxu1 %v5656_v60  ;;  %v5740_v60 = vld [vmem:[%s8310_s1 + $0x74] ss:$24 sps:$4 sm:$0xff]  }
  0xb6   : > { %4041 = vmatpush1.bf16.msra.mxu0 %v5659_v62  ;;  %3919 = vmatprep.subr.bf16.mxu1 %v5664_v63  ;;  %v5735_v62 = vld [vmem:[%s8310_s1 + $0x68] ss:$24 sps:$4 sm:$0xff]  }
  0xb7   : > { %4042 = vmatprep.subr.bf16.mxu0 %v5667_v0  ;;  %v5738_v63 = vld [vmem:[%s8310_s1 + $0x70] ss:$24 sps:$4 sm:$0xff]   ;;  %v5743_v0 = vld [vmem:[%s8310_s1 + $0x9c] ss:$24 sps:$4 sm:$0xff]  }
  0xb9   : > { %3920 = vmatpush1.bf16.msra.mxu1 %v5662_v1  ;;  %v5741_v1 = vld [vmem:[%s8310_s1 + $0x98] ss:$24 sps:$4 sm:$0xff]  }
  0xba   : > { %4043 = vmatpush1.bf16.msra.mxu0 %v5665_v3  ;;  %3921 = vmatprep.subr.bf16.mxu1 %v5670_v4  ;;  %v5744_v3 = vld [vmem:[%s8310_s1 + $0xa0] ss:$24 sps:$4 sm:$0xff]   ;;  %v5749_v4 = vld [vmem:[%s8310_s1 + $0xcc] ss:$24 sps:$4 sm:$0xff]  }
  0xbb   : > { %4044 = vmatprep.subr.bf16.mxu0 %v5673_v5  ;;  %v5752_v5 = vld [vmem:[%s8310_s1 + $0xd4] ss:$24 sps:$4 sm:$0xff]  }
  0xbd   : > { %3922 = vmatpush1.bf16.msra.mxu1 %v5668_v6  ;;  %v5747_v6 = vld [vmem:[%s8310_s1 + $0xc8] ss:$24 sps:$4 sm:$0xff]  }
  0xbe   : > { %4045 = vmatpush1.bf16.msra.mxu0 %v5671_v7  ;;  %3923 = vmatprep.subr.bf16.mxu1 %v5676_v8  ;;  %v5750_v7 = vld [vmem:[%s8310_s1 + $0xd0] ss:$24 sps:$4 sm:$0xff]   ;;  %v5755_v8 = vld [vmem:[%s8310_s1 + $0xfc] ss:$24 sps:$4 sm:$0xff]  }
  0xbf   : > { %4046 = vmatprep.subr.bf16.mxu0 %v5679_v9  ;;  %v5758_v9 = vld [vmem:[%s8310_s1 + $0x104] ss:$24 sps:$4 sm:$0xff]  }
  0xc1   : > { %3924 = vmatpush1.bf16.msra.mxu1 %v5674_v10  ;;  %v5753_v10 = vld [vmem:[%s8310_s1 + $0xf8] ss:$24 sps:$4 sm:$0xff]  }
  0xc2   : > { %4047 = vmatpush1.bf16.msra.mxu0 %v5677_v11  ;;  %3925 = vmatprep.subr.bf16.mxu1 %v5682_v12  ;;  %v5756_v11 = vld [vmem:[%s8310_s1 + $0x100] ss:$24 sps:$4 sm:$0xff]   ;;  %v5761_v12 = vld [vmem:[%s8310_s1 + $0x12c] ss:$24 sps:$4 sm:$0xff]  }
  0xc3   : > { %4048 = vmatprep.subr.bf16.mxu0 %v5685_v13  ;;  %v5764_v13 = vld [vmem:[%s8310_s1 + $0x134] ss:$24 sps:$4 sm:$0xff]  }
  0xc5   : > { %3926 = vmatpush1.bf16.msra.mxu1 %v5680_v14  ;;  %v5759_v14 = vld [vmem:[%s8310_s1 + $0x128] ss:$24 sps:$4 sm:$0xff]  }
  0xc6   : > { %4049 = vmatpush1.bf16.msra.mxu0 %v5683_v15  ;;  %3927 = vmatprep.subr.bf16.mxu1 %v5688_v18  ;;  %v5762_v15 = vld [vmem:[%s8310_s1 + $0x130] ss:$24 sps:$4 sm:$0xff]   ;;  %v5767_v18 = vld [vmem:[%s8310_s1 + $0x15c] ss:$24 sps:$4 sm:$0xff]  }
  0xc7   : > { %4050 = vmatprep.subr.bf16.mxu0 %v5691_v19  ;;  %v5770_v19 = vld [vmem:[%s8310_s1 + $0x164] ss:$24 sps:$4 sm:$0xff]  }
  0xc9   : > { %3928 = vmatpush1.bf16.msra.mxu1 %v5686_v20  ;;  %v5765_v20 = vld [vmem:[%s8310_s1 + $0x158] ss:$24 sps:$4 sm:$0xff]  }
  0xca   : > { %4051 = vmatpush1.bf16.msra.mxu0 %v5689_v21  ;;  %3929 = vmatprep.subr.bf16.mxu1 %v5694_v23  ;;  %v5768_v21 = vld [vmem:[%s8310_s1 + $0x160] ss:$24 sps:$4 sm:$0xff]   ;;  %v5773_v23 = vld [vmem:[%s8310_s1 + $0x18c] ss:$24 sps:$4 sm:$0xff]  }
  0xcb   : > { %4052 = vmatprep.subr.bf16.mxu0 %v5697_v24  ;;  %v5776_v24 = vld [vmem:[%s8310_s1 + $0x194] ss:$24 sps:$4 sm:$0xff]  }
  0xcd   : > { %3930 = vmatpush1.bf16.msra.mxu1 %v5692_v25  ;;  %v5771_v25 = vld [vmem:[%s8310_s1 + $0x188] ss:$24 sps:$4 sm:$0xff]  }
  0xce   : > { %4053 = vmatpush1.bf16.msra.mxu0 %v5695_v26  ;;  %3931 = vmatprep.subr.bf16.mxu1 %v5700_v27  ;;  %v5774_v26 = vld [vmem:[%s8310_s1 + $0x190] ss:$24 sps:$4 sm:$0xff]   ;;  %v5779_v27 = vld [vmem:[%s8310_s1 + $0x1bc] ss:$24 sps:$4 sm:$0xff]  }
  0xcf   : > { %4054 = vmatprep.subr.bf16.mxu0 %v5703_v28  ;;  %v5782_v28 = vld [vmem:[%s8310_s1 + $0x1c4] ss:$24 sps:$4 sm:$0xff]  }
  0xd1   : > { %3932 = vmatpush1.bf16.msra.mxu1 %v5698_v29  ;;  %v5777_v29 = vld [vmem:[%s8310_s1 + $0x1b8] ss:$24 sps:$4 sm:$0xff]  }
  0xd2   : > { %4055 = vmatpush1.bf16.msra.mxu0 %v5701_v30  ;;  %3933 = vmatprep.subr.bf16.mxu1 %v5706_v31  ;;  %v5780_v30 = vld [vmem:[%s8310_s1 + $0x1c0] ss:$24 sps:$4 sm:$0xff]   ;;  %v5785_v31 = vld [vmem:[%s8310_s1 + $0x1ec] ss:$24 sps:$4 sm:$0xff]  }
  0xd3   : > { %4056 = vmatprep.subr.bf16.mxu0 %v5709_v33  ;;  %v5788_v33 = vld [vmem:[%s8310_s1 + $0x1f4] ss:$24 sps:$4 sm:$0xff]  }
  0xd5   : > { %3934 = vmatpush1.bf16.msra.mxu1 %v5704_v34  ;;  %v5783_v34 = vld [vmem:[%s8310_s1 + $0x1e8] ss:$24 sps:$4 sm:$0xff]  }
  0xd6   : > { %4057 = vmatpush1.bf16.msra.mxu0 %v5707_v35  ;;  %3935 = vmatprep.subr.bf16.mxu1 %v5712_v49  ;;  %v5786_v35 = vld [vmem:[%s8310_s1 + $0x1f0] ss:$24 sps:$4 sm:$0xff]   ;;  %v5791_v49 = vld [vmem:[%s8310_s1 + $0x21c] ss:$24 sps:$4 sm:$0xff]  }
  0xd7   : > { %4058 = vmatprep.subr.bf16.mxu0 %v5715_v38  ;;  %v5794_v38 = vld [vmem:[%s8310_s1 + $0x224] ss:$24 sps:$4 sm:$0xff]  }
  0xd9   : > { %3936 = vmatpush1.bf16.msra.mxu1 %v5710_v39  ;;  %v5789_v39 = vld [vmem:[%s8310_s1 + $0x218] ss:$24 sps:$4 sm:$0xff]  }
  0xda   : > { %4059 = vmatpush1.bf16.msra.mxu0 %v5713_v40  ;;  %3937 = vmatprep.subr.bf16.mxu1 %v5718_v41  ;;  %v5792_v40 = vld [vmem:[%s8310_s1 + $0x220] ss:$24 sps:$4 sm:$0xff]   ;;  %v5797_v41 = vld [vmem:[%s8310_s1 + $0x24c] ss:$24 sps:$4 sm:$0xff]  }
  0xdb   : > { %4060 = vmatprep.subr.bf16.mxu0 %v5721_v43  ;;  %v5800_v43 = vld [vmem:[%s8310_s1 + $0x254] ss:$24 sps:$4 sm:$0xff]  }
  0xdd   : > { %3938 = vmatpush1.bf16.msra.mxu1 %v5716_v44  ;;  %v5795_v44 = vld [vmem:[%s8310_s1 + $0x248] ss:$24 sps:$4 sm:$0xff]  }
  0xde   : > { %4061 = vmatpush1.bf16.msra.mxu0 %v5719_v45  ;;  %4071 = vmatprep.subr.bf16.mxu1 %v5725_v46  ;;  %v5798_v45 = vld [vmem:[%s8310_s1 + $0x250] ss:$24 sps:$4 sm:$0xff]   ;;  %v5803_v46 = vld [vmem:[%s8310_s1 + $0x27c] ss:$24 sps:$4 sm:$0xff]  }
  0xdf   : > { %4317 = vmatprep.subr.bf16.mxu0 %v5728_v47  ;;  %v5806_v47 = vld [vmem:[%s8310_s1 + $0x284] ss:$24 sps:$4 sm:$0xff]  }
  0xe0   : > { %3940 = vmatmul.mubr.bf16.vlgmr.msra.gmra.mrb[0].mxu1 %v6658_v17 }
  0xe1   : > { %4063 = vmatmul.mubr.bf16.vlgmr.msra.gmra.mrb[0].mxu0 %v6874_v32  ;;  %4072 = vmatpush1.bf16.msra.mxu1 %v5723_v50  ;;  %v5801_v50 = vld [vmem:[%s8310_s1 + $0x278] ss:$24 sps:$4 sm:$0xff]  }
  0xe2   : > { %4318 = vmatpush1.bf16.msra.mxu0 %v5726_v52  ;;  %4073 = vmatprep.subr.bf16.mxu1 %v5731_v53  ;;  %v5804_v52 = vld [vmem:[%s8310_s1 + $0x280] ss:$24 sps:$4 sm:$0xff]   ;;  %v5809_v53 = vld [vmem:[%s8310_s1 + $0x2ac] ss:$24 sps:$4 sm:$0xff]  }
  0xe3   : > { %4319 = vmatprep.subr.bf16.mxu0 %v5734_v55  ;;  %4103 = vmatprep.mubr.bf16.mxu1 %v6595_v59  ;;  %v5812_v55 = vld [vmem:[%s8310_s1 + $0x2b4] ss:$24 sps:$4 sm:$0xff]  }
  0xe4   : > { %4349 = vmatprep.mubr.bf16.mxu0 %v6595_v59  ;;  %v5746_v59 = vld [vmem:[%s8310_s1 + $0xa4] ss:$24 sps:$4 sm:$0xff]  }
  0xe5   : > { %4074 = vmatpush1.bf16.msra.mxu1 %v5729_v56  ;;  %v5807_v56 = vld [vmem:[%s8310_s1 + $0x2a8] ss:$24 sps:$4 sm:$0xff]  }
  0xe6   : > { %4320 = vmatpush1.bf16.msra.mxu0 %v5732_v57  ;;  %4075 = vmatprep.subr.bf16.mxu1 %v5737_v58  ;;  %v5810_v57 = vld [vmem:[%s8310_s1 + $0x2b0] ss:$24 sps:$4 sm:$0xff]   ;;  %v5815_v58 = vld [vmem:[%s8310_s1 + $0x2dc] ss:$24 sps:$4 sm:$0xff]  }
  0xe7   : > { %4321 = vmatprep.subr.bf16.mxu0 %v5740_v60  ;;  %v5818_v60 = vld [vmem:[%s8310_s1 + $0x2e4] ss:$24 sps:$4 sm:$0xff]  }
  0xe9   : > { %4076 = vmatpush1.bf16.msra.mxu1 %v5735_v62  ;;  %v5813_v62 = vld [vmem:[%s8310_s1 + $0x2d8] ss:$24 sps:$4 sm:$0xff]  }
  0xea   : > { %4322 = vmatpush1.bf16.msra.mxu0 %v5738_v63  ;;  %4077 = vmatprep.subr.bf16.mxu1 %v5743_v0  ;;  %v5816_v63 = vld [vmem:[%s8310_s1 + $0x2e0] ss:$24 sps:$4 sm:$0xff]   ;;  %v5821_v0 = vld [vmem:[%s8310_s1 + $0x30c] ss:$24 sps:$4 sm:$0xff]  }
  0xeb   : > { %4323 = vmatprep.subr.bf16.mxu0 %v5746_v59  ;;  %v5824_v59 = vld [vmem:[%s8310_s1 + $0x314] ss:$24 sps:$4 sm:$0xff]  }
  0xed   : > { %4078 = vmatpush1.bf16.msra.mxu1 %v5741_v1  ;;  %v5819_v1 = vld [vmem:[%s8310_s1 + $0x308] ss:$24 sps:$4 sm:$0xff]  }
  0xee   : > { %4324 = vmatpush1.bf16.msra.mxu0 %v5744_v3  ;;  %4079 = vmatprep.subr.bf16.mxu1 %v5749_v4  ;;  %v5822_v3 = vld [vmem:[%s8310_s1 + $0x310] ss:$24 sps:$4 sm:$0xff]   ;;  %v5827_v4 = vld [vmem:[%s8310_s1 + $0x33c] ss:$24 sps:$4 sm:$0xff]  }
  0xef   : > { %4325 = vmatprep.subr.bf16.mxu0 %v5752_v5  ;;  %v5830_v5 = vld [vmem:[%s8310_s1 + $0x344] ss:$24 sps:$4 sm:$0xff]  }
  0xf1   : > { %4080 = vmatpush1.bf16.msra.mxu1 %v5747_v6  ;;  %v5825_v6 = vld [vmem:[%s8310_s1 + $0x338] ss:$24 sps:$4 sm:$0xff]  }
  0xf2   : > { %4326 = vmatpush1.bf16.msra.mxu0 %v5750_v7  ;;  %4081 = vmatprep.subr.bf16.mxu1 %v5755_v8  ;;  %v5828_v7 = vld [vmem:[%s8310_s1 + $0x340] ss:$24 sps:$4 sm:$0xff]   ;;  %v5833_v8 = vld [vmem:[%s8310_s1 + $0x36c] ss:$24 sps:$4 sm:$0xff]  }
  0xf3   : > { %4327 = vmatprep.subr.bf16.mxu0 %v5758_v9  ;;  %v5831_v9 = vld [vmem:[%s8310_s1 + $0x368] ss:$24 sps:$4 sm:$0xff]  }
  0xf5   : > { %4082 = vmatpush1.bf16.msra.mxu1 %v5753_v10  ;;  %v5834_v10 = vld [vmem:[%s8310_s1 + $0x370] ss:$24 sps:$4 sm:$0xff]  }
  0xf6   : > { %4328 = vmatpush1.bf16.msra.mxu0 %v5756_v11  ;;  %4083 = vmatprep.subr.bf16.mxu1 %v5761_v12  ;;  %v5839_v11 = vld [vmem:[%s8310_s1 + $0x39c] ss:$24 sps:$4 sm:$0xff]   ;;  %v5837_v12 = vld [vmem:[%s8310_s1 + $0x398] ss:$24 sps:$4 sm:$0xff]  }
  0xf7   : > { %4329 = vmatprep.subr.bf16.mxu0 %v5764_v13  ;;  %v5840_v13 = vld [vmem:[%s8310_s1 + $0x3a0] ss:$24 sps:$4 sm:$0xff]  }
  0xf9   : > { %4084 = vmatpush1.bf16.msra.mxu1 %v5759_v14  ;;  %v5845_v14 = vld [vmem:[%s8310_s1 + $0x3cc] ss:$24 sps:$4 sm:$0xff]  }
  0xfa   : > { %4330 = vmatpush1.bf16.msra.mxu0 %v5762_v15  ;;  %4085 = vmatprep.subr.bf16.mxu1 %v5767_v18  ;;  %v5848_v15 = vld [vmem:[%s8310_s1 + $0x3d4] ss:$24 sps:$4 sm:$0xff]   ;;  %v5843_v18 = vld [vmem:[%s8310_s1 + $0x3c8] ss:$24 sps:$4 sm:$0xff]  }
  0xfb   : > { %4331 = vmatprep.subr.bf16.mxu0 %v5770_v19  ;;  %v5846_v19 = vld [vmem:[%s8310_s1 + $0x3d0] ss:$24 sps:$4 sm:$0xff]  }
  0xfd   : > { %4086 = vmatpush1.bf16.msra.mxu1 %v5765_v20  ;;  %v5851_v20 = vld [vmem:[%s8310_s1 + $0x3fc] ss:$24 sps:$4 sm:$0xff]  }
  0xfe   : > { %4332 = vmatpush1.bf16.msra.mxu0 %v5768_v21  ;;  %4087 = vmatprep.subr.bf16.mxu1 %v5773_v23  ;;  %v5854_v21 = vld [vmem:[%s8310_s1 + $0x404] ss:$24 sps:$4 sm:$0xff]   ;;  %v5849_v23 = vld [vmem:[%s8310_s1 + $0x3f8] ss:$24 sps:$4 sm:$0xff]  }
  0xff   : > { %4333 = vmatprep.subr.bf16.mxu0 %v5776_v24  ;;  %v5852_v24 = vld [vmem:[%s8310_s1 + $0x400] ss:$24 sps:$4 sm:$0xff]  }
 0x101   : > { %4088 = vmatpush1.bf16.msra.mxu1 %v5771_v25  ;;  %v5857_v25 = vld [vmem:[%s8310_s1 + $0x42c] ss:$24 sps:$4 sm:$0xff]  }
 0x102   : > { %4334 = vmatpush1.bf16.msra.mxu0 %v5774_v26  ;;  %4089 = vmatprep.subr.bf16.mxu1 %v5779_v27  ;;  %v5860_v26 = vld [vmem:[%s8310_s1 + $0x434] ss:$24 sps:$4 sm:$0xff]   ;;  %v5855_v27 = vld [vmem:[%s8310_s1 + $0x428] ss:$24 sps:$4 sm:$0xff]  }
 0x103   : > { %4335 = vmatprep.subr.bf16.mxu0 %v5782_v28  ;;  %v5858_v28 = vld [vmem:[%s8310_s1 + $0x430] ss:$24 sps:$4 sm:$0xff]  }
 0x105   : > { %4090 = vmatpush1.bf16.msra.mxu1 %v5777_v29  ;;  %v5863_v29 = vld [vmem:[%s8310_s1 + $0x45c] ss:$24 sps:$4 sm:$0xff]  }
 0x106   : > { %4336 = vmatpush1.bf16.msra.mxu0 %v5780_v30  ;;  %4091 = vmatprep.subr.bf16.mxu1 %v5785_v31  ;;  %v5866_v30 = vld [vmem:[%s8310_s1 + $0x464] ss:$24 sps:$4 sm:$0xff]   ;;  %v5861_v31 = vld [vmem:[%s8310_s1 + $0x458] ss:$24 sps:$4 sm:$0xff]  }
 0x107   : > { %4337 = vmatprep.subr.bf16.mxu0 %v5788_v33  ;;  %v5864_v33 = vld [vmem:[%s8310_s1 + $0x460] ss:$24 sps:$4 sm:$0xff]  }
 0x109   : > { %4092 = vmatpush1.bf16.msra.mxu1 %v5783_v34  ;;  %v5869_v34 = vld [vmem:[%s8310_s1 + $0x48c] ss:$24 sps:$4 sm:$0xff]  }
 0x10a   : > { %4338 = vmatpush1.bf16.msra.mxu0 %v5786_v35  ;;  %4093 = vmatprep.subr.bf16.mxu1 %v5791_v49  ;;  %v5872_v35 = vld [vmem:[%s8310_s1 + $0x494] ss:$24 sps:$4 sm:$0xff]   ;;  %v5867_v49 = vld [vmem:[%s8310_s1 + $0x488] ss:$24 sps:$4 sm:$0xff]  }
 0x10b   : > { %4339 = vmatprep.subr.bf16.mxu0 %v5794_v38  ;;  %v5870_v38 = vld [vmem:[%s8310_s1 + $0x490] ss:$24 sps:$4 sm:$0xff]  }
 0x10d   : > { %4094 = vmatpush1.bf16.msra.mxu1 %v5789_v39  ;;  %v5875_v39 = vld [vmem:[%s8310_s1 + $0x4bc] ss:$24 sps:$4 sm:$0xff]  }
 0x10e   : > { %4340 = vmatpush1.bf16.msra.mxu0 %v5792_v40  ;;  %4095 = vmatprep.subr.bf16.mxu1 %v5797_v41  ;;  %v5878_v40 = vld [vmem:[%s8310_s1 + $0x4c4] ss:$24 sps:$4 sm:$0xff]   ;;  %v5873_v41 = vld [vmem:[%s8310_s1 + $0x4b8] ss:$24 sps:$4 sm:$0xff]  }
 0x10f   : > { %4341 = vmatprep.subr.bf16.mxu0 %v5800_v43  ;;  %v5876_v43 = vld [vmem:[%s8310_s1 + $0x4c0] ss:$24 sps:$4 sm:$0xff]  }
 0x111   : > { %4096 = vmatpush1.bf16.msra.mxu1 %v5795_v44  ;;  %v5881_v44 = vld [vmem:[%s8310_s1 + $0x4ec] ss:$24 sps:$4 sm:$0xff]  }
 0x112   : > { %4342 = vmatpush1.bf16.msra.mxu0 %v5798_v45  ;;  %4097 = vmatprep.subr.bf16.mxu1 %v5803_v46  ;;  %v5884_v45 = vld [vmem:[%s8310_s1 + $0x4f4] ss:$24 sps:$4 sm:$0xff]   ;;  %v5879_v46 = vld [vmem:[%s8310_s1 + $0x4e8] ss:$24 sps:$4 sm:$0xff]  }
 0x113   : > { %4343 = vmatprep.subr.bf16.mxu0 %v5806_v47  ;;  %v5882_v47 = vld [vmem:[%s8310_s1 + $0x4f0] ss:$24 sps:$4 sm:$0xff]  }
 0x115   : > { %4098 = vmatpush1.bf16.msra.mxu1 %v5801_v50  ;;  %v5887_v50 = vld [vmem:[%s8310_s1 + $0x51c] ss:$24 sps:$4 sm:$0xff]  }
 0x116   : > { %4344 = vmatpush1.bf16.msra.mxu0 %v5804_v52  ;;  %4099 = vmatprep.subr.bf16.mxu1 %v5809_v53  ;;  %v5890_v52 = vld [vmem:[%s8310_s1 + $0x524] ss:$24 sps:$4 sm:$0xff]   ;;  %v5885_v53 = vld [vmem:[%s8310_s1 + $0x518] ss:$24 sps:$4 sm:$0xff]  }
 0x117   : > { %4345 = vmatprep.subr.bf16.mxu0 %v5812_v55  ;;  %v5888_v55 = vld [vmem:[%s8310_s1 + $0x520] ss:$24 sps:$4 sm:$0xff]  }
 0x119   : > { %4100 = vmatpush1.bf16.msra.mxu1 %v5807_v56  ;;  %v5893_v56 = vld [vmem:[%s8310_s1 + $0x54c] ss:$24 sps:$4 sm:$0xff]  }
 0x11a   : > { %4346 = vmatpush1.bf16.msra.mxu0 %v5810_v57  ;;  %4101 = vmatprep.subr.bf16.mxu1 %v5815_v58  ;;  %v5896_v57 = vld [vmem:[%s8310_s1 + $0x554] ss:$24 sps:$4 sm:$0xff]   ;;  %v5891_v58 = vld [vmem:[%s8310_s1 + $0x548] ss:$24 sps:$4 sm:$0xff]  }
 0x11b   : > { %4347 = vmatprep.subr.bf16.mxu0 %v5818_v60  ;;  %v5894_v60 = vld [vmem:[%s8310_s1 + $0x550] ss:$24 sps:$4 sm:$0xff]  }
 0x11d   : > { %4102 = vmatpush1.bf16.msra.mxu1 %v5813_v62  ;;  %v5899_v62 = vld [vmem:[%s8310_s1 + $0x57c] ss:$24 sps:$4 sm:$0xff]  }
 0x11e   : > { %4348 = vmatpush1.bf16.msra.mxu0 %v5816_v63  ;;  %4112 = vmatprep.subr.bf16.mxu1 %v5821_v0  ;;  %v5902_v63 = vld [vmem:[%s8310_s1 + $0x584] ss:$24 sps:$4 sm:$0xff]   ;;  %v5897_v0 = vld [vmem:[%s8310_s1 + $0x578] ss:$24 sps:$4 sm:$0xff]  }
 0x11f   : > { %4358 = vmatprep.subr.bf16.mxu0 %v5824_v59  ;;  %v5900_v59 = vld [vmem:[%s8310_s1 + $0x580] ss:$24 sps:$4 sm:$0xff]  }
 0x120   : > { %4104 = vmatmul.mubr.bf16.vlgmr.msra.gmra.mrb[4].mxu1 %v6581_v54 }
 0x121   : > { %4350 = vmatmul.mubr.bf16.vlgmr.msra.gmra.mrb[4].mxu0 %v6581_v54  ;;  %4113 = vmatpush1.bf16.msra.mxu1 %v5819_v1  ;;  %v5836_v54 = vld [vmem:[%s8310_s1 + $0x374] ss:$24 sps:$4 sm:$0xff]  }
 0x122   : > { %4359 = vmatpush1.bf16.msra.mxu0 %v5822_v3  ;;  %4114 = vmatprep.subr.bf16.mxu1 %v5827_v4  ;;  %v5905_v1 = vld [vmem:[%s8310_s1 + $0x5ac] ss:$24 sps:$4 sm:$0xff]   ;;  %v5903_v4 = vld [vmem:[%s8310_s1 + $0x5a8] ss:$24 sps:$4 sm:$0xff]  }
 0x123   : > { %4360 = vmatprep.subr.bf16.mxu0 %v5830_v5  ;;  %4144 = vmatprep.mubr.bf16.mxu1 %v6674_v22  ;;  %v5908_v3 = vld [vmem:[%s8310_s1 + $0x5b4] ss:$24 sps:$4 sm:$0xff]   ;;  %v5906_v5 = vld [vmem:[%s8310_s1 + $0x5b0] ss:$24 sps:$4 sm:$0xff]  }
 0x124   : > { %4390 = vmatprep.mubr.bf16.mxu0 %v6674_v22  ;;  %v5842_v22 = vld [vmem:[%s8310_s1 + $0x3a4] ss:$24 sps:$4 sm:$0xff]  }
 0x125   : > { %4115 = vmatpush1.bf16.msra.mxu1 %v5825_v6  ;;  %v5911_v6 = vld [vmem:[%s8310_s1 + $0x5dc] ss:$24 sps:$4 sm:$0xff]  }
 0x126   : > { %4361 = vmatpush1.bf16.msra.mxu0 %v5828_v7  ;;  %4116 = vmatprep.subr.bf16.mxu1 %v5833_v8  ;;  %v5914_v7 = vld [vmem:[%s8310_s1 + $0x5e4] ss:$24 sps:$4 sm:$0xff]   ;;  %v5909_v8 = vld [vmem:[%s8310_s1 + $0x5d8] ss:$24 sps:$4 sm:$0xff]  }
 0x127   : > { %4362 = vmatprep.subr.bf16.mxu0 %v5836_v54  ;;  %v5912_v54 = vld [vmem:[%s8310_s1 + $0x5e0] ss:$24 sps:$4 sm:$0xff]  }
 0x129   : > { %4117 = vmatpush1.bf16.msra.mxu1 %v5831_v9  ;;  %v5917_v9 = vld [vmem:[%s8310_s1 + $0x60c] ss:$24 sps:$4 sm:$0xff]  }
 0x12a   : > { %4363 = vmatpush1.bf16.msra.mxu0 %v5834_v10  ;;  %4118 = vmatprep.subr.bf16.mxu1 %v5839_v11  ;;  %v5920_v10 = vld [vmem:[%s8310_s1 + $0x614] ss:$24 sps:$4 sm:$0xff]   ;;  %v5915_v11 = vld [vmem:[%s8310_s1 + $0x608] ss:$24 sps:$4 sm:$0xff]  }
 0x12b   : > { %4364 = vmatprep.subr.bf16.mxu0 %v5842_v22  ;;  %v5918_v22 = vld [vmem:[%s8310_s1 + $0x610] ss:$24 sps:$4 sm:$0xff]  }
 0x12d   : > { %4119 = vmatpush1.bf16.msra.mxu1 %v5837_v12  ;;  %v5923_v12 = vld [vmem:[%s8310_s1 + $0x63c] ss:$24 sps:$4 sm:$0xff]  }
 0x12e   : > { %4365 = vmatpush1.bf16.msra.mxu0 %v5840_v13  ;;  %4120 = vmatprep.subr.bf16.mxu1 %v5845_v14  ;;  %v5926_v13 = vld [vmem:[%s8310_s1 + $0x644] ss:$24 sps:$4 sm:$0xff]   ;;  %v5921_v14 = vld [vmem:[%s8310_s1 + $0x638] ss:$24 sps:$4 sm:$0xff]  }
 0x12f   : > { %4366 = vmatprep.subr.bf16.mxu0 %v5848_v15  ;;  %v5924_v15 = vld [vmem:[%s8310_s1 + $0x640] ss:$24 sps:$4 sm:$0xff]  }
 0x131   : > { %4121 = vmatpush1.bf16.msra.mxu1 %v5843_v18  ;;  %v5929_v18 = vld [vmem:[%s8310_s1 + $0x66c] ss:$24 sps:$4 sm:$0xff]  }
 0x132   : > { %4367 = vmatpush1.bf16.msra.mxu0 %v5846_v19  ;;  %4122 = vmatprep.subr.bf16.mxu1 %v5851_v20  ;;  %v5927_v19 = vld [vmem:[%s8310_s1 + $0x668] ss:$24 sps:$4 sm:$0xff]  }
 0x133   : > { %4368 = vmatprep.subr.bf16.mxu0 %v5854_v21  ;;  %v5930_v20 = vld [vmem:[%s8310_s1 + $0x670] ss:$24 sps:$4 sm:$0xff]   ;;  %v5935_v21 = vld [vmem:[%s8310_s1 + $0x69c] ss:$24 sps:$4 sm:$0xff]  }
 0x135   : > { %4123 = vmatpush1.bf16.msra.mxu1 %v5849_v23  ;;  %v5933_v23 = vld [vmem:[%s8310_s1 + $0x698] ss:$24 sps:$4 sm:$0xff]  }
 0x136   : > { %4369 = vmatpush1.bf16.msra.mxu0 %v5852_v24  ;;  %4124 = vmatprep.subr.bf16.mxu1 %v5857_v25  ;;  %v5936_v24 = vld [vmem:[%s8310_s1 + $0x6a0] ss:$24 sps:$4 sm:$0xff]   ;;  %v5941_v25 = vld [vmem:[%s8310_s1 + $0x6cc] ss:$24 sps:$4 sm:$0xff]  }
 0x137   : > { %4370 = vmatprep.subr.bf16.mxu0 %v5860_v26  ;;  %v5944_v26 = vld [vmem:[%s8310_s1 + $0x6d4] ss:$24 sps:$4 sm:$0xff]  }
 0x139   : > { %4125 = vmatpush1.bf16.msra.mxu1 %v5855_v27  ;;  %v5939_v27 = vld [vmem:[%s8310_s1 + $0x6c8] ss:$24 sps:$4 sm:$0xff]  }
 0x13a   : > { %4371 = vmatpush1.bf16.msra.mxu0 %v5858_v28  ;;  %4126 = vmatprep.subr.bf16.mxu1 %v5863_v29  ;;  %v5942_v28 = vld [vmem:[%s8310_s1 + $0x6d0] ss:$24 sps:$4 sm:$0xff]   ;;  %v5947_v29 = vld [vmem:[%s8310_s1 + $0x6fc] ss:$24 sps:$4 sm:$0xff]  }
 0x13b   : > { %4372 = vmatprep.subr.bf16.mxu0 %v5866_v30  ;;  %v5950_v30 = vld [vmem:[%s8310_s1 + $0x704] ss:$24 sps:$4 sm:$0xff]  }
 0x13d   : > { %4127 = vmatpush1.bf16.msra.mxu1 %v5861_v31  ;;  %v5945_v31 = vld [vmem:[%s8310_s1 + $0x6f8] ss:$24 sps:$4 sm:$0xff]  }
 0x13e   : > { %4373 = vmatpush1.bf16.msra.mxu0 %v5864_v33  ;;  %4128 = vmatprep.subr.bf16.mxu1 %v5869_v34  ;;  %v5948_v33 = vld [vmem:[%s8310_s1 + $0x700] ss:$24 sps:$4 sm:$0xff]   ;;  %v5953_v34 = vld [vmem:[%s8310_s1 + $0x72c] ss:$24 sps:$4 sm:$0xff]  }
 0x13f   : > { %4374 = vmatprep.subr.bf16.mxu0 %v5872_v35  ;;  %v5956_v35 = vld [vmem:[%s8310_s1 + $0x734] ss:$24 sps:$4 sm:$0xff]  }
 0x141   : > { %4129 = vmatpush1.bf16.msra.mxu1 %v5867_v49  ;;  %v5951_v49 = vld [vmem:[%s8310_s1 + $0x728] ss:$24 sps:$4 sm:$0xff]  }
 0x142   : > { %4375 = vmatpush1.bf16.msra.mxu0 %v5870_v38  ;;  %4130 = vmatprep.subr.bf16.mxu1 %v5875_v39  ;;  %v5954_v38 = vld [vmem:[%s8310_s1 + $0x730] ss:$24 sps:$4 sm:$0xff]   ;;  %v5959_v39 = vld [vmem:[%s8310_s1 + $0x75c] ss:$24 sps:$4 sm:$0xff]  }
 0x143   : > { %4376 = vmatprep.subr.bf16.mxu0 %v5878_v40  ;;  %v5962_v40 = vld [vmem:[%s8310_s1 + $0x764] ss:$24 sps:$4 sm:$0xff]  }
 0x145   : > { %4131 = vmatpush1.bf16.msra.mxu1 %v5873_v41  ;;  %v5957_v41 = vld [vmem:[%s8310_s1 + $0x758] ss:$24 sps:$4 sm:$0xff]  }
 0x146   : > { %4377 = vmatpush1.bf16.msra.mxu0 %v5876_v43  ;;  %4132 = vmatprep.subr.bf16.mxu1 %v5881_v44  ;;  %v5960_v43 = vld [vmem:[%s8310_s1 + $0x760] ss:$24 sps:$4 sm:$0xff]   ;;  %v5965_v44 = vld [vmem:[%s8310_s1 + $0x78c] ss:$24 sps:$4 sm:$0xff]  }
 0x147   : > { %4378 = vmatprep.subr.bf16.mxu0 %v5884_v45  ;;  %v5968_v45 = vld [vmem:[%s8310_s1 + $0x794] ss:$24 sps:$4 sm:$0xff]  }
 0x149   : > { %4133 = vmatpush1.bf16.msra.mxu1 %v5879_v46  ;;  %v5963_v46 = vld [vmem:[%s8310_s1 + $0x788] ss:$24 sps:$4 sm:$0xff]  }
 0x14a   : > { %4379 = vmatpush1.bf16.msra.mxu0 %v5882_v47  ;;  %4134 = vmatprep.subr.bf16.mxu1 %v5887_v50  ;;  %v5966_v47 = vld [vmem:[%s8310_s1 + $0x790] ss:$24 sps:$4 sm:$0xff]   ;;  %v5971_v50 = vld [vmem:[%s8310_s1 + $0x7bc] ss:$24 sps:$4 sm:$0xff]  }
 0x14b   : > { %4380 = vmatprep.subr.bf16.mxu0 %v5890_v52  ;;  %v5974_v52 = vld [vmem:[%s8310_s1 + $0x7c4] ss:$24 sps:$4 sm:$0xff]  }
 0x14d   : > { %4135 = vmatpush1.bf16.msra.mxu1 %v5885_v53  ;;  %v5969_v53 = vld [vmem:[%s8310_s1 + $0x7b8] ss:$24 sps:$4 sm:$0xff]  }
 0x14e   : > { %4381 = vmatpush1.bf16.msra.mxu0 %v5888_v55  ;;  %4136 = vmatprep.subr.bf16.mxu1 %v5893_v56  ;;  %v5972_v55 = vld [vmem:[%s8310_s1 + $0x7c0] ss:$24 sps:$4 sm:$0xff]   ;;  %v5977_v56 = vld [vmem:[%s8310_s1 + $0x7ec] ss:$24 sps:$4 sm:$0xff]  }
 0x14f   : > { %4382 = vmatprep.subr.bf16.mxu0 %v5896_v57  ;;  %v5980_v57 = vld [vmem:[%s8310_s1 + $0x7f4] ss:$24 sps:$4 sm:$0xff]  }
 0x151   : > { %4137 = vmatpush1.bf16.msra.mxu1 %v5891_v58  ;;  %v5975_v58 = vld [vmem:[%s8310_s1 + $0x7e8] ss:$24 sps:$4 sm:$0xff]  }
 0x152   : > { %4383 = vmatpush1.bf16.msra.mxu0 %v5894_v60  ;;  %4138 = vmatprep.subr.bf16.mxu1 %v5899_v62  ;;  %v5978_v60 = vld [vmem:[%s8310_s1 + $0x7f0] ss:$24 sps:$4 sm:$0xff]   ;;  %v5983_v62 = vld [vmem:[%s8310_s1 + $0x81c] ss:$24 sps:$4 sm:$0xff]  }
 0x153   : > { %4384 = vmatprep.subr.bf16.mxu0 %v5902_v63  ;;  %v5986_v63 = vld [vmem:[%s8310_s1 + $0x824] ss:$24 sps:$4 sm:$0xff]  }
 0x155   : > { %4139 = vmatpush1.bf16.msra.mxu1 %v5897_v0  ;;  %v5981_v0 = vld [vmem:[%s8310_s1 + $0x818] ss:$24 sps:$4 sm:$0xff]  }
 0x156   : > { %4385 = vmatpush1.bf16.msra.mxu0 %v5900_v59  ;;  %4140 = vmatprep.subr.bf16.mxu1 %v5905_v1  ;;  %v5984_v59 = vld [vmem:[%s8310_s1 + $0x820] ss:$24 sps:$4 sm:$0xff]   ;;  %v5989_v1 = vld [vmem:[%s8310_s1 + $0x84c] ss:$24 sps:$4 sm:$0xff]  }
 0x157   : > { %4386 = vmatprep.subr.bf16.mxu0 %v5908_v3  ;;  %v5992_v3 = vld [vmem:[%s8310_s1 + $0x854] ss:$24 sps:$4 sm:$0xff]  }
 0x159   : > { %4141 = vmatpush1.bf16.msra.mxu1 %v5903_v4  ;;  %v5987_v4 = vld [vmem:[%s8310_s1 + $0x848] ss:$24 sps:$4 sm:$0xff]  }
 0x15a   : > { %4387 = vmatpush1.bf16.msra.mxu0 %v5906_v5  ;;  %4142 = vmatprep.subr.bf16.mxu1 %v5911_v6  ;;  %v5990_v5 = vld [vmem:[%s8310_s1 + $0x850] ss:$24 sps:$4 sm:$0xff]   ;;  %v5995_v6 = vld [vmem:[%s8310_s1 + $0x87c] ss:$24 sps:$4 sm:$0xff]  }
 0x15b   : > { %4388 = vmatprep.subr.bf16.mxu0 %v5914_v7  ;;  %v5998_v7 = vld [vmem:[%s8310_s1 + $0x884] ss:$24 sps:$4 sm:$0xff]  }
 0x15d   : > { %4143 = vmatpush1.bf16.msra.mxu1 %v5909_v8  ;;  %v5993_v8 = vld [vmem:[%s8310_s1 + $0x878] ss:$24 sps:$4 sm:$0xff]  }
 0x15e   : > { %4389 = vmatpush1.bf16.msra.mxu0 %v5912_v54  ;;  %4153 = vmatprep.subr.bf16.mxu1 %v5917_v9  ;;  %v5996_v54 = vld [vmem:[%s8310_s1 + $0x880] ss:$24 sps:$4 sm:$0xff]   ;;  %v6001_v9 = vld [vmem:[%s8310_s1 + $0x8ac] ss:$24 sps:$4 sm:$0xff]  }
 0x15f   : > { %4399 = vmatprep.subr.bf16.mxu0 %v5920_v10  ;;  %v6004_v10 = vld [vmem:[%s8310_s1 + $0x8b4] ss:$24 sps:$4 sm:$0xff]  }
 0x160   : > { %4145 = vmatmul.mubr.bf16.vlgmr.msra.gmra.mrb[4].mxu1 %v6655_v16 }
 0x161   : > { %4391 = vmatmul.mubr.bf16.vlgmr.msra.gmra.mrb[4].mxu0 %v6655_v16  ;;  %4154 = vmatpush1.bf16.msra.mxu1 %v5915_v11  ;;  %v5932_v16 = vld [vmem:[%s8310_s1 + $0x674] ss:$24 sps:$4 sm:$0xff]   ;;  %v5999_v11 = vld [vmem:[%s8310_s1 + $0x8a8] ss:$24 sps:$4 sm:$0xff]  }
 0x162   : > { %4400 = vmatpush1.bf16.msra.mxu0 %v5918_v22  ;;  %4155 = vmatprep.subr.bf16.mxu1 %v5923_v12  ;;  %v6002_v22 = vld [vmem:[%s8310_s1 + $0x8b0] ss:$24 sps:$4 sm:$0xff]   ;;  %v6007_v12 = vld [vmem:[%s8310_s1 + $0x8dc] ss:$24 sps:$4 sm:$0xff]  }
 0x163   : > { %4401 = vmatprep.subr.bf16.mxu0 %v5926_v13  ;;  %4185 = vmatprep.mubr.bf16.mxu1 %v6890_v36  ;;  %v6010_v13 = vld [vmem:[%s8310_s1 + $0x8e4] ss:$24 sps:$4 sm:$0xff]  }
 0x164   : > { %4431 = vmatprep.mubr.bf16.mxu0 %v6890_v36  ;;  %v5938_v36 = vld [vmem:[%s8310_s1 + $0x6a4] ss:$24 sps:$4 sm:$0xff]  }
 0x165   : > { %4156 = vmatpush1.bf16.msra.mxu1 %v5921_v14  ;;  %v6005_v14 = vld [vmem:[%s8310_s1 + $0x8d8] ss:$24 sps:$4 sm:$0xff]  }
 0x166   : > { %4402 = vmatpush1.bf16.msra.mxu0 %v5924_v15  ;;  %4157 = vmatprep.subr.bf16.mxu1 %v5929_v18  ;;  %v6008_v15 = vld [vmem:[%s8310_s1 + $0x8e0] ss:$24 sps:$4 sm:$0xff]   ;;  %v6013_v18 = vld [vmem:[%s8310_s1 + $0x90c] ss:$24 sps:$4 sm:$0xff]  }
 0x167   : > { %4403 = vmatprep.subr.bf16.mxu0 %v5932_v16  ;;  %v6016_v16 = vld [vmem:[%s8310_s1 + $0x914] ss:$24 sps:$4 sm:$0xff]  }
 0x169   : > { %4158 = vmatpush1.bf16.msra.mxu1 %v5927_v19  ;;  %v6011_v19 = vld [vmem:[%s8310_s1 + $0x908] ss:$24 sps:$4 sm:$0xff]  }
 0x16a   : > { %4404 = vmatpush1.bf16.msra.mxu0 %v5930_v20  ;;  %4159 = vmatprep.subr.bf16.mxu1 %v5935_v21  ;;  %v6014_v20 = vld [vmem:[%s8310_s1 + $0x910] ss:$24 sps:$4 sm:$0xff]   ;;  %v6019_v21 = vld [vmem:[%s8310_s1 + $0x93c] ss:$24 sps:$4 sm:$0xff]  }
 0x16b   : > { %4405 = vmatprep.subr.bf16.mxu0 %v5938_v36  ;;  %v6022_v36 = vld [vmem:[%s8310_s1 + $0x944] ss:$24 sps:$4 sm:$0xff]  }
 0x16d   : > { %4160 = vmatpush1.bf16.msra.mxu1 %v5933_v23  ;;  %v6017_v23 = vld [vmem:[%s8310_s1 + $0x938] ss:$24 sps:$4 sm:$0xff]  }
 0x16e   : > { %4406 = vmatpush1.bf16.msra.mxu0 %v5936_v24  ;;  %4161 = vmatprep.subr.bf16.mxu1 %v5941_v25  ;;  %v6020_v24 = vld [vmem:[%s8310_s1 + $0x940] ss:$24 sps:$4 sm:$0xff]   ;;  %v6025_v25 = vld [vmem:[%s8310_s1 + $0x96c] ss:$24 sps:$4 sm:$0xff]  }
 0x16f   : > { %4407 = vmatprep.subr.bf16.mxu0 %v5944_v26  ;;  %v6023_v26 = vld [vmem:[%s8310_s1 + $0x968] ss:$24 sps:$4 sm:$0xff]  }
 0x171   : > { %4162 = vmatpush1.bf16.msra.mxu1 %v5939_v27  ;;  %v6026_v27 = vld [vmem:[%s8310_s1 + $0x970] ss:$24 sps:$4 sm:$0xff]  }
 0x172   : > { %4408 = vmatpush1.bf16.msra.mxu0 %v5942_v28  ;;  %4163 = vmatprep.subr.bf16.mxu1 %v5947_v29  ;;  %v6031_v28 = vld [vmem:[%s8310_s1 + $0x99c] ss:$24 sps:$4 sm:$0xff]   ;;  %v6029_v29 = vld [vmem:[%s8310_s1 + $0x998] ss:$24 sps:$4 sm:$0xff]  }
 0x173   : > { %4409 = vmatprep.subr.bf16.mxu0 %v5950_v30  ;;  %v6032_v30 = vld [vmem:[%s8310_s1 + $0x9a0] ss:$24 sps:$4 sm:$0xff]  }
 0x175   : > { %4164 = vmatpush1.bf16.msra.mxu1 %v5945_v31  ;;  %v6037_v31 = vld [vmem:[%s8310_s1 + $0x9cc] ss:$24 sps:$4 sm:$0xff]  }
 0x176   : > { %4410 = vmatpush1.bf16.msra.mxu0 %v5948_v33  ;;  %4165 = vmatprep.subr.bf16.mxu1 %v5953_v34  ;;  %v6040_v33 = vld [vmem:[%s8310_s1 + $0x9d4] ss:$24 sps:$4 sm:$0xff]   ;;  %v6035_v34 = vld [vmem:[%s8310_s1 + $0x9c8] ss:$24 sps:$4 sm:$0xff]  }
 0x177   : > { %4411 = vmatprep.subr.bf16.mxu0 %v5956_v35  ;;  %v851_v35 = vsub.s32 0, %v6544_v42 }
 0x179   : > { %4166 = vmatpush1.bf16.msra.mxu1 %v5951_v49  ;;  %v6038_v49 = vld [vmem:[%s8310_s1 + $0x9d0] ss:$24 sps:$4 sm:$0xff]  }
 0x17a   : > { %4412 = vmatpush1.bf16.msra.mxu0 %v5954_v38  ;;  %4167 = vmatprep.subr.bf16.mxu1 %v5959_v39  ;;  %v7730_v38 = vld [vmem:[%s8311_s2] sm:$0x3f]  ;;  %v855_v39 = vsub.s32 1, %v6544_v42 }
 0x17b   : > { %4413 = vmatprep.subr.bf16.mxu0 %v5962_v40  ;;  %v6043_v40 = vld [vmem:[%s8310_s1 + $0x9fc] ss:$24 sps:$4 sm:$0xff]  }
 0x17d   : > { %4168 = vmatpush1.bf16.msra.mxu1 %v5957_v41  ;;  %v6046_v41 = vld [vmem:[%s8310_s1 + $0xa04] ss:$24 sps:$4 sm:$0xff]  }
 0x17e   : > { %4414 = vmatpush1.bf16.msra.mxu0 %v5960_v43  ;;  %4169 = vmatprep.subr.bf16.mxu1 %v5965_v44  ;;  %v852_v43 = vrot.slane %v7730_v38, %v851_v35  ;;  %v856_v44 = vrot.slane %v7730_v38, %v855_v39 }
 0x17f   : > { %4415 = vmatprep.subr.bf16.mxu0 %v5968_v45  ;;  %v6041_v45 = vld [vmem:[%s8310_s1 + $0x9f8] ss:$24 sps:$4 sm:$0xff]  }
 0x181   : > { %4170 = vmatpush1.bf16.msra.mxu1 %v5963_v46  ;;  %v6044_v46 = vld [vmem:[%s8310_s1 + $0xa00] ss:$24 sps:$4 sm:$0xff]  }
 0x182   : > { %4416 = vmatpush1.bf16.msra.mxu0 %v5966_v47  ;;  %4171 = vmatprep.subr.bf16.mxu1 %v5971_v50  ;;  %v6049_v47 = vld [vmem:[%s8310_s1 + $0xa2c] ss:$24 sps:$4 sm:$0xff]  }
 0x183   : > { %4417 = vmatprep.subr.bf16.mxu0 %v5974_v52  ;;  %v6052_v50 = vld [vmem:[%s8310_s1 + $0xa34] ss:$24 sps:$4 sm:$0xff]  }
 0x185   : > { %4172 = vmatpush1.bf16.msra.mxu1 %v5969_v53 }
 0x186   : > { %4418 = vmatpush1.bf16.msra.mxu0 %v5972_v55  ;;  %4173 = vmatprep.subr.bf16.mxu1 %v5977_v56  ;;  %v7756_v55 = vld [vmem:[%s8312_s3] sm:$0x3f] }
 0x187   : > { %4419 = vmatprep.subr.bf16.mxu0 %v5980_v57 }
 0x189   : > { %4174 = vmatpush1.bf16.msra.mxu1 %v5975_v58 }
 0x18a   : > { %4420 = vmatpush1.bf16.msra.mxu0 %v5978_v60  ;;  %4175 = vmatprep.subr.bf16.mxu1 %v5983_v62 }
 0x18b   : > { %4421 = vmatprep.subr.bf16.mxu0 %v5986_v63 }
 0x18d   : > { %4176 = vmatpush1.bf16.msra.mxu1 %v5981_v0  ;;  %v6047_v0 = vld [vmem:[%s8310_s1 + $0xa28] ss:$24 sps:$4 sm:$0xff]  }
 0x18e   : > { %4422 = vmatpush1.bf16.msra.mxu0 %v5984_v59  ;;  %4177 = vmatprep.subr.bf16.mxu1 %v5989_v1  ;;  %v6050_v59 = vld [vmem:[%s8310_s1 + $0xa30] ss:$24 sps:$4 sm:$0xff]  }
 0x18f   : > { %4423 = vmatprep.subr.bf16.mxu0 %v5992_v3  ;;  %v4574_v3 = vrot.slane %v7756_v55, %v851_v35  ;;  %v6083_v35 = vld [vmem:[%s8310_s1 + $0xb48] ss:$24 sps:$4 sm:$0xff]  }
 0x191   : > { %4178 = vmatpush1.bf16.msra.mxu1 %v5987_v4 }
 0x192   : > { %4424 = vmatpush1.bf16.msra.mxu0 %v5990_v5  ;;  %4179 = vmatprep.subr.bf16.mxu1 %v5995_v6  ;;  %v6055_v6 = vld [vmem:[%s8310_s1 + $0xa5c] ss:$24 sps:$4 sm:$0xff]  }
 0x193   : > { %4425 = vmatprep.subr.bf16.mxu0 %v5998_v7  ;;  %v6058_v7 = vld [vmem:[%s8310_s1 + $0xa64] ss:$24 sps:$4 sm:$0xff]  }
 0x195   : > { %4180 = vmatpush1.bf16.msra.mxu1 %v5993_v8 }
 0x196   : > { %4426 = vmatpush1.bf16.msra.mxu0 %v5996_v54  ;;  %4181 = vmatprep.subr.bf16.mxu1 %v6001_v9  ;;  %v4578_v54 = vrot.slane %v7756_v55, %v855_v39  ;;  %v6091_v39 = vld [vmem:[%s8310_s1 + $0xb7c] ss:$24 sps:$4 sm:$0xff]  }
 0x197   : > { %4427 = vmatprep.subr.bf16.mxu0 %v6004_v10 }
 0x199   : > { %4182 = vmatpush1.bf16.msra.mxu1 %v5999_v11  ;;  %v6053_v11 = vld [vmem:[%s8310_s1 + $0xa58] ss:$24 sps:$4 sm:$0xff]  }
 0x19a   : > { %4428 = vmatpush1.bf16.msra.mxu0 %v6002_v22  ;;  %4183 = vmatprep.subr.bf16.mxu1 %v6007_v12  ;;  %v6056_v22 = vld [vmem:[%s8310_s1 + $0xa60] ss:$24 sps:$4 sm:$0xff]  }
 0x19b   : > { %4429 = vmatprep.subr.bf16.mxu0 %v6010_v13  ;;  %v6061_v13 = vld [vmem:[%s8310_s1 + $0xa8c] ss:$24 sps:$4 sm:$0xff]  }
 0x19d   : > { %4184 = vmatpush1.bf16.msra.mxu1 %v6005_v14  ;;  %v6064_v14 = vld [vmem:[%s8310_s1 + $0xa94] ss:$24 sps:$4 sm:$0xff]  }
 0x19e   : > { %4430 = vmatpush1.bf16.msra.mxu0 %v6008_v15  ;;  %4194 = vmatprep.subr.bf16.mxu1 %v6013_v18 }
 0x19f   : > { %4440 = vmatprep.subr.bf16.mxu0 %v6016_v16  ;;  %v6059_v16 = vld [vmem:[%s8310_s1 + $0xa88] ss:$24 sps:$4 sm:$0xff]  }
 0x1a0   : > { %4186 = vmatmul.mubr.bf16.vlgmr.msra.gmra.mrb[4].mxu1 %v6658_v17 }
 0x1a1   : > { %4432 = vmatmul.mubr.bf16.vlgmr.msra.gmra.mrb[4].mxu0 %v6658_v17  ;;  %4195 = vmatpush1.bf16.msra.mxu1 %v6011_v19  ;;  %v6028_v17 = vld [vmem:[%s8310_s1 + $0x974] ss:$24 sps:$4 sm:$0xff]   ;;  %v6062_v19 = vld [vmem:[%s8310_s1 + $0xa90] ss:$24 sps:$4 sm:$0xff]  }
 0x1a2   : > { %4441 = vmatpush1.bf16.msra.mxu0 %v6014_v20  ;;  %4196 = vmatprep.subr.bf16.mxu1 %v6019_v21  ;;  %v6067_v21 = vld [vmem:[%s8310_s1 + $0xabc] ss:$24 sps:$4 sm:$0xff]  }
 0x1a3   : > { %4442 = vmatprep.subr.bf16.mxu0 %v6022_v36  ;;  %4226 = vmatprep.mubr.bf16.mxu1 %v6615_v2  ;;  %v6070_v36 = vld [vmem:[%s8310_s1 + $0xac4] ss:$24 sps:$4 sm:$0xff]  }
 0x1a4   : > { %4472 = vmatprep.mubr.bf16.mxu0 %v6615_v2  ;;  %v6034_v2 = vld [vmem:[%s8310_s1 + $0x9a4] ss:$24 sps:$4 sm:$0xff]  }
 0x1a5   : > { %4197 = vmatpush1.bf16.msra.mxu1 %v6017_v23 }
 0x1a6   : > { %4443 = vmatpush1.bf16.msra.mxu0 %v6020_v24  ;;  %4198 = vmatprep.subr.bf16.mxu1 %v6025_v25  ;;  %v6065_v24 = vld [vmem:[%s8310_s1 + $0xab8] ss:$24 sps:$4 sm:$0xff]  }
 0x1a7   : > { %4444 = vmatprep.subr.bf16.mxu0 %v6028_v17  ;;  %v6068_v25 = vld [vmem:[%s8310_s1 + $0xac0] ss:$24 sps:$4 sm:$0xff]   ;;  %v6073_v17 = vld [vmem:[%s8310_s1 + $0xaec] ss:$24 sps:$4 sm:$0xff]  }
 0x1a9   : > { %4199 = vmatpush1.bf16.msra.mxu1 %v6023_v26  ;;  %v6076_v26 = vld [vmem:[%s8310_s1 + $0xaf4] ss:$24 sps:$4 sm:$0xff]  }
 0x1aa   : > { %4445 = vmatpush1.bf16.msra.mxu0 %v6026_v27  ;;  %4200 = vmatprep.subr.bf16.mxu1 %v6031_v28  ;;  %v6071_v27 = vld [vmem:[%s8310_s1 + $0xae8] ss:$24 sps:$4 sm:$0xff]  }
 0x1ab   : > { %4446 = vmatprep.subr.bf16.mxu0 %v6034_v2  ;;  %v6074_v28 = vld [vmem:[%s8310_s1 + $0xaf0] ss:$24 sps:$4 sm:$0xff]   ;;  %v6079_v2 = vld [vmem:[%s8310_s1 + $0xb1c] ss:$24 sps:$4 sm:$0xff]  }
 0x1ad   : > { %4201 = vmatpush1.bf16.msra.mxu1 %v6029_v29  ;;  %v6082_v29 = vld [vmem:[%s8310_s1 + $0xb24] ss:$24 sps:$4 sm:$0xff]  }
 0x1ae   : > { %4447 = vmatpush1.bf16.msra.mxu0 %v6032_v30  ;;  %4202 = vmatprep.subr.bf16.mxu1 %v6037_v31  ;;  %v6077_v30 = vld [vmem:[%s8310_s1 + $0xb18] ss:$24 sps:$4 sm:$0xff]  }
 0x1af   : > { %4448 = vmatprep.subr.bf16.mxu0 %v6040_v33  ;;  %v6080_v31 = vld [vmem:[%s8310_s1 + $0xb20] ss:$24 sps:$4 sm:$0xff]   ;;  %v6085_v33 = vld [vmem:[%s8310_s1 + $0xb4c] ss:$24 sps:$4 sm:$0xff]  }
 0x1b1   : > { %4203 = vmatpush1.bf16.msra.mxu1 %v6035_v34  ;;  %v6088_v34 = vld [vmem:[%s8310_s1 + $0xb54] ss:$24 sps:$4 sm:$0xff]  }
 0x1b2   : > { %4449 = vmatpush1.bf16.msra.mxu0 %v6038_v49  ;;  %4204 = vmatprep.subr.bf16.mxu1 %v6043_v40  ;;  %v6086_v49 = vld [vmem:[%s8310_s1 + $0xb50] ss:$24 sps:$4 sm:$0xff]   ;;  %v6094_v40 = vld [vmem:[%s8310_s1 + $0xb84] ss:$24 sps:$4 sm:$0xff]  }
 0x1b3   : > { %4450 = vmatprep.subr.bf16.mxu0 %v6046_v41  ;;  %v3941_v52 = vpop.f32.mrb[0].mxu1  ;;  %v6089_v41 = vld [vmem:[%s8310_s1 + $0xb78] ss:$24 sps:$4 sm:$0xff]  }
 0x1b4   : > { %v4064_v53 = vpop.f32.mrb[0].mxu0  ;;  %v5330_v56 = vadd.f32 %v3941_v52, %v852_v43  ;;  %v3943_v57 = vpop.f32.mrb[1].mxu1  ;;  %v6092_v43 = vld [vmem:[%s8310_s1 + $0xb80] ss:$24 sps:$4 sm:$0xff]   ;;  %v6106_v52 = vld [vmem:[%s8310_s1 + $0xbe4] ss:$24 sps:$4 sm:$0xff]  }
 0x1b5   : > { %v4066_v58 = vpop.f32.mrb[1].mxu0  ;;  %v5332_v60 = vadd.f32 %v3943_v57, %v856_v44  ;;  %v3945_v62 = vpop.f32.mrb[2].mxu1  ;;  %4205 = vmatpush1.bf16.msra.mxu1 %v6041_v45  ;;  %v6097_v44 = vld [vmem:[%s8310_s1 + $0xbac] ss:$24 sps:$4 sm:$0xff]  }
 0x1b6   : > { %v4068_v63 = vpop.f32.mrb[2].mxu0  ;;  %4451 = vmatpush1.bf16.msra.mxu0 %v6044_v46  ;;  %v5331_v1 = vadd.f32 %v5330_v56, %v4064_v53  ;;  %v3946_v4 = vpop.f32.mrb[3].mxu1  ;;  %4206 = vmatprep.subr.bf16.mxu1 %v6049_v47  ;;  %v6100_v45 = vld [vmem:[%s8310_s1 + $0xbb4] ss:$24 sps:$4 sm:$0xff]   ;;  %v6095_v46 = vld [vmem:[%s8310_s1 + $0xba8] ss:$24 sps:$4 sm:$0xff]  }
 0x1b7   : > { %v4069_v5 = vpop.f32.mrb[3].mxu0  ;;  %4452 = vmatprep.subr.bf16.mxu0 %v6052_v50  ;;  %v5333_v8 = vadd.f32 %v5332_v60, %v4066_v58  ;;  %v6098_v47 = vld [vmem:[%s8310_s1 + $0xbb0] ss:$24 sps:$4 sm:$0xff]   ;;  %v6103_v50 = vld [vmem:[%s8310_s1 + $0xbdc] ss:$24 sps:$4 sm:$0xff]  }
 0x1b8   : > { %v4563_v9 = vmax.f32 %v5331_v1, 0.0  ;;  %v6101_v53 = vld [vmem:[%s8310_s1 + $0xbd8] ss:$24 sps:$4 sm:$0xff]   ;;  %v6109_v57 = vld [vmem:[%s8310_s1 + $0xc0c] ss:$24 sps:$4 sm:$0xff]  }
 0x1b9   : > { %v4564_v10 = vmax.f32 %v5333_v8, 0.0  ;;  %4207 = vmatpush1.bf16.msra.mxu1 %v6047_v0  ;;  %v6104_v56 = vld [vmem:[%s8310_s1 + $0xbe0] ss:$24 sps:$4 sm:$0xff]   ;;  %v6112_v58 = vld [vmem:[%s8310_s1 + $0xc14] ss:$24 sps:$4 sm:$0xff]  }
 0x1ba   : > { %4453 = vmatpush1.bf16.msra.mxu0 %v6050_v59  ;;  %v4601_v12 = vmul.f32 %v4574_v3, %v4563_v9  ;;  %4208 = vmatprep.subr.bf16.mxu1 %v6055_v6  ;;  %v6107_v60 = vld [vmem:[%s8310_s1 + $0xc08] ss:$24 sps:$4 sm:$0xff]   ;;  %v6115_v63 = vld [vmem:[%s8310_s1 + $0xc3c] ss:$24 sps:$4 sm:$0xff]   ;;  %v6113_v59 = vld [vmem:[%s8310_s1 + $0xc38] ss:$24 sps:$4 sm:$0xff]  }
 0x1bb   : > { %4454 = vmatprep.subr.bf16.mxu0 %v6058_v7  ;;  %v4602_v15 = vmul.f32 %v4578_v54, %v4564_v10  ;;  %v6110_v62 = vld [vmem:[%s8310_s1 + $0xc10] ss:$24 sps:$4 sm:$0xff]   ;;  %v6118_v0 = vld [vmem:[%s8310_s1 + $0xc44] ss:$24 sps:$4 sm:$0xff]   ;;  %v6116_v1 = vld [vmem:[%s8310_s1 + $0xc40] ss:$24 sps:$4 sm:$0xff]  }
 0x1bc   : > { %v4608_v18 = vsel %vm4607_vm0, %v4601_v12, 0.0  ;;  %v6121_v3 = vld [vmem:[%s8310_s1 + $0xc6c] ss:$24 sps:$4 sm:$0xff]   ;;  %v6119_v4 = vld [vmem:[%s8310_s1 + $0xc68] ss:$24 sps:$4 sm:$0xff]  }
 0x1bd   : > { %4209 = vmatpush1.bf16.msra.mxu1 %v6053_v11  ;;  %v4609_v20 = vsel %vm4607_vm0, %v4602_v15, 0.0  ;;  %v6122_v5 = vld [vmem:[%s8310_s1 + $0xc70] ss:$24 sps:$4 sm:$0xff]   ;;  %v6127_v6 = vld [vmem:[%s8310_s1 + $0xc9c] ss:$24 sps:$4 sm:$0xff]  }
 0x1be   : > { %4455 = vmatpush1.bf16.msra.mxu0 %v6056_v22  ;;  %4210 = vmatprep.subr.bf16.mxu1 %v6061_v13  ;;  %v7798_v23 = vadd.f32 %v4609_v20, %v4608_v18  ;;  %v6125_v7 = vld [vmem:[%s8310_s1 + $0xc98] ss:$24 sps:$4 sm:$0xff]   ;;  %v6133_v54 = vld [vmem:[%s8310_s1 + $0xccc] ss:$24 sps:$4 sm:$0xff]   ;;  %v6131_v10 = vld [vmem:[%s8310_s1 + $0xcc8] ss:$24 sps:$4 sm:$0xff]  }
 0x1bf   : > { %4456 = vmatprep.subr.bf16.mxu0 %v6064_v14  ;;  %v6128_v8 = vld [vmem:[%s8310_s1 + $0xca0] ss:$24 sps:$4 sm:$0xff]   ;;  %v6136_v9 = vld [vmem:[%s8310_s1 + $0xcd4] ss:$24 sps:$4 sm:$0xff]   ;;  %v6134_v11 = vld [vmem:[%s8310_s1 + $0xcd0] ss:$24 sps:$4 sm:$0xff]  }
 0x1c0   : > { %v6139_v22 = vld [vmem:[%s8310_s1 + $0xcfc] ss:$24 sps:$4 sm:$0xff]   ;;  %v6137_v13 = vld [vmem:[%s8310_s1 + $0xcf8] ss:$24 sps:$4 sm:$0xff]   ;;  %v6145_v15 = vld [vmem:[%s8310_s1 + $0xd2c] ss:$24 sps:$4 sm:$0xff]  }
 0x1c1   : > { %4211 = vmatpush1.bf16.msra.mxu1 %v6059_v16  ;;  %v6142_v12 = vld [vmem:[%s8310_s1 + $0xd04] ss:$24 sps:$4 sm:$0xff]   ;;  %v6140_v14 = vld [vmem:[%s8310_s1 + $0xd00] ss:$24 sps:$4 sm:$0xff]   ;;  %v6148_v18 = vld [vmem:[%s8310_s1 + $0xd34] ss:$24 sps:$4 sm:$0xff]  }
 0x1c2   : > { %4457 = vmatpush1.bf16.msra.mxu0 %v6062_v19  ;;  %4212 = vmatprep.subr.bf16.mxu1 %v6067_v21  ;;  %v6143_v16 = vld [vmem:[%s8310_s1 + $0xd28] ss:$24 sps:$4 sm:$0xff]   ;;  %v6151_v20 = vld [vmem:[%s8310_s1 + $0xd5c] ss:$24 sps:$4 sm:$0xff]  }
 0x1c3   : > { %4458 = vmatprep.subr.bf16.mxu0 %v6070_v36  ;;  %v6146_v19 = vld [vmem:[%s8310_s1 + $0xd30] ss:$24 sps:$4 sm:$0xff]   ;;  %v6154_v21 = vld [vmem:[%s8310_s1 + $0xd64] ss:$24 sps:$4 sm:$0xff]  }
 0x1c4   : > { %v6149_v36 = vld [vmem:[%s8310_s1 + $0xd58] ss:$24 sps:$4 sm:$0xff]  }
 0x1c5   : > { %4213 = vmatpush1.bf16.msra.mxu1 %v6065_v24  ;;  %v6152_v24 = vld [vmem:[%s8310_s1 + $0xd60] ss:$24 sps:$4 sm:$0xff]  }
 0x1c6   : > { %4459 = vmatpush1.bf16.msra.mxu0 %v6068_v25  ;;  %4214 = vmatprep.subr.bf16.mxu1 %v6073_v17  ;;  %v6157_v25 = vld [vmem:[%s8310_s1 + $0xd8c] ss:$24 sps:$4 sm:$0xff]  }
 0x1c7   : > { %4460 = vmatprep.subr.bf16.mxu0 %v6076_v26  ;;  %v6160_v17 = vld [vmem:[%s8310_s1 + $0xd94] ss:$24 sps:$4 sm:$0xff]   ;;  %v6155_v26 = vld [vmem:[%s8310_s1 + $0xd88] ss:$24 sps:$4 sm:$0xff]  }
 0x1c9   : > { %4215 = vmatpush1.bf16.msra.mxu1 %v6071_v27  ;;  %v6158_v27 = vld [vmem:[%s8310_s1 + $0xd90] ss:$24 sps:$4 sm:$0xff]  }
 0x1ca   : > { %4461 = vmatpush1.bf16.msra.mxu0 %v6074_v28  ;;  %4216 = vmatprep.subr.bf16.mxu1 %v6079_v2  ;;  %v6163_v28 = vld [vmem:[%s8310_s1 + $0xdbc] ss:$24 sps:$4 sm:$0xff]  }
 0x1cb   : > { %4462 = vmatprep.subr.bf16.mxu0 %v6082_v29  ;;  %v6166_v2 = vld [vmem:[%s8310_s1 + $0xdc4] ss:$24 sps:$4 sm:$0xff]   ;;  %v6161_v29 = vld [vmem:[%s8310_s1 + $0xdb8] ss:$24 sps:$4 sm:$0xff]  }
 0x1cd   : > { %4217 = vmatpush1.bf16.msra.mxu1 %v6077_v30  ;;  %v6164_v30 = vld [vmem:[%s8310_s1 + $0xdc0] ss:$24 sps:$4 sm:$0xff]  }
 0x1ce   : > { %4463 = vmatpush1.bf16.msra.mxu0 %v6080_v31  ;;  %4218 = vmatprep.subr.bf16.mxu1 %v6085_v33  ;;  %v6169_v31 = vld [vmem:[%s8310_s1 + $0xdec] ss:$24 sps:$4 sm:$0xff]  }
 0x1cf   : > { %4464 = vmatprep.subr.bf16.mxu0 %v6088_v34  ;;  %v6172_v33 = vld [vmem:[%s8310_s1 + $0xdf4] ss:$24 sps:$4 sm:$0xff]   ;;  %v6167_v34 = vld [vmem:[%s8310_s1 + $0xde8] ss:$24 sps:$4 sm:$0xff]  }
 0x1d1   : > { %4219 = vmatpush1.bf16.msra.mxu1 %v6083_v35  ;;  %v6170_v35 = vld [vmem:[%s8310_s1 + $0xdf0] ss:$24 sps:$4 sm:$0xff]  }
 0x1d2   : > { %4465 = vmatpush1.bf16.msra.mxu0 %v6086_v49  ;;  %4220 = vmatprep.subr.bf16.mxu1 %v6091_v39  ;;  %v6175_v49 = vld [vmem:[%s8310_s1 + $0xe1c] ss:$24 sps:$4 sm:$0xff]  }
 0x1d3   : > { %4466 = vmatprep.subr.bf16.mxu0 %v6094_v40  ;;  %v6178_v39 = vld [vmem:[%s8310_s1 + $0xe24] ss:$24 sps:$4 sm:$0xff]   ;;  %v6173_v40 = vld [vmem:[%s8310_s1 + $0xe18] ss:$24 sps:$4 sm:$0xff]  }
 0x1d5   : > { %4221 = vmatpush1.bf16.msra.mxu1 %v6089_v41  ;;  %v6176_v41 = vld [vmem:[%s8310_s1 + $0xe20] ss:$24 sps:$4 sm:$0xff]  }
 0x1d6   : > { %4467 = vmatpush1.bf16.msra.mxu0 %v6092_v43  ;;  %4222 = vmatprep.subr.bf16.mxu1 %v6097_v44  ;;  %v6181_v43 = vld [vmem:[%s8310_s1 + $0xe4c] ss:$24 sps:$4 sm:$0xff]  }
 0x1d7   : > { %4468 = vmatprep.subr.bf16.mxu0 %v6100_v45  ;;  %v6184_v44 = vld [vmem:[%s8310_s1 + $0xe54] ss:$24 sps:$4 sm:$0xff]   ;;  %v6179_v45 = vld [vmem:[%s8310_s1 + $0xe48] ss:$24 sps:$4 sm:$0xff]  }
 0x1d9   : > { %4223 = vmatpush1.bf16.msra.mxu1 %v6095_v46  ;;  %v6182_v46 = vld [vmem:[%s8310_s1 + $0xe50] ss:$24 sps:$4 sm:$0xff]  }
 0x1da   : > { %4469 = vmatpush1.bf16.msra.mxu0 %v6098_v47  ;;  %4224 = vmatprep.subr.bf16.mxu1 %v6103_v50  ;;  %v6187_v47 = vld [vmem:[%s8310_s1 + $0xe7c] ss:$24 sps:$4 sm:$0xff]  }
 0x1db   : > { %4470 = vmatprep.subr.bf16.mxu0 %v6106_v52  ;;  %v6190_v50 = vld [vmem:[%s8310_s1 + $0xe84] ss:$24 sps:$4 sm:$0xff]   ;;  %v6185_v52 = vld [vmem:[%s8310_s1 + $0xe78] ss:$24 sps:$4 sm:$0xff]  }
 0x1dd   : > { %4225 = vmatpush1.bf16.msra.mxu1 %v6101_v53  ;;  %v6188_v53 = vld [vmem:[%s8310_s1 + $0xe80] ss:$24 sps:$4 sm:$0xff]  }
 0x1de   : > { %4471 = vmatpush1.bf16.msra.mxu0 %v6104_v56  ;;  %4235 = vmatprep.subr.bf16.mxu1 %v6109_v57  ;;  %v6193_v56 = vld [vmem:[%s8310_s1 + $0xeac] ss:$24 sps:$4 sm:$0xff]  }
 0x1df   : > { %4481 = vmatprep.subr.bf16.mxu0 %v6112_v58  ;;  %v6196_v57 = vld [vmem:[%s8310_s1 + $0xeb4] ss:$24 sps:$4 sm:$0xff]   ;;  %v6191_v58 = vld [vmem:[%s8310_s1 + $0xea8] ss:$24 sps:$4 sm:$0xff]  }
 0x1e0   : > { %4227 = vmatmul.mubr.bf16.vlgmr.msra.gmra.mrb[4].mxu1 %v6599_v61 }
 0x1e1   : > { %4473 = vmatmul.mubr.bf16.vlgmr.msra.gmra.mrb[4].mxu0 %v6599_v61  ;;  %4236 = vmatpush1.bf16.msra.mxu1 %v6107_v60  ;;  %v6124_v61 = vld [vmem:[%s8310_s1 + $0xc74] ss:$24 sps:$4 sm:$0xff]   ;;  %v6194_v60 = vld [vmem:[%s8310_s1 + $0xeb0] ss:$24 sps:$4 sm:$0xff]  }
 0x1e2   : > { %4482 = vmatpush1.bf16.msra.mxu0 %v6110_v62  ;;  %4237 = vmatprep.subr.bf16.mxu1 %v6115_v63  ;;  %v6199_v62 = vld [vmem:[%s8310_s1 + $0xedc] ss:$24 sps:$4 sm:$0xff]  }
 0x1e3   : > { %4483 = vmatprep.subr.bf16.mxu0 %v6118_v0  ;;  %4267 = vmatprep.mubr.bf16.mxu1 %v6760_v51  ;;  %v6202_v63 = vld [vmem:[%s8310_s1 + $0xee4] ss:$24 sps:$4 sm:$0xff]   ;;  %v6197_v0 = vld [vmem:[%s8310_s1 + $0xed8] ss:$24 sps:$4 sm:$0xff]  }
 0x1e4   : > { %4513 = vmatprep.mubr.bf16.mxu0 %v6760_v51  ;;  %v6130_v51 = vld [vmem:[%s8310_s1 + $0xca4] ss:$24 sps:$4 sm:$0xff]  }
 0x1e5   : > { %4238 = vmatpush1.bf16.msra.mxu1 %v6113_v59  ;;  %v6200_v59 = vld [vmem:[%s8310_s1 + $0xee0] ss:$24 sps:$4 sm:$0xff]  }
 0x1e6   : > { %4484 = vmatpush1.bf16.msra.mxu0 %v6116_v1  ;;  %4239 = vmatprep.subr.bf16.mxu1 %v6121_v3  ;;  %v6205_v1 = vld [vmem:[%s8310_s1 + $0xf0c] ss:$24 sps:$4 sm:$0xff]  }
 0x1e7   : > { %4485 = vmatprep.subr.bf16.mxu0 %v6124_v61  ;;  %v6208_v3 = vld [vmem:[%s8310_s1 + $0xf14] ss:$24 sps:$4 sm:$0xff]   ;;  %v6203_v61 = vld [vmem:[%s8310_s1 + $0xf08] ss:$24 sps:$4 sm:$0xff]  }
 0x1e9   : > { %4240 = vmatpush1.bf16.msra.mxu1 %v6119_v4  ;;  %v6206_v4 = vld [vmem:[%s8310_s1 + $0xf10] ss:$24 sps:$4 sm:$0xff]  }
 0x1ea   : > { %4486 = vmatpush1.bf16.msra.mxu0 %v6122_v5  ;;  %4241 = vmatprep.subr.bf16.mxu1 %v6127_v6  ;;  %v6211_v5 = vld [vmem:[%s8310_s1 + $0xf3c] ss:$24 sps:$4 sm:$0xff]  }
 0x1eb   : > { %4487 = vmatprep.subr.bf16.mxu0 %v6130_v51  ;;  %v6214_v6 = vld [vmem:[%s8310_s1 + $0xf44] ss:$24 sps:$4 sm:$0xff]   ;;  %v6209_v51 = vld [vmem:[%s8310_s1 + $0xf38] ss:$24 sps:$4 sm:$0xff]  }
 0x1ed   : > { %4242 = vmatpush1.bf16.msra.mxu1 %v6125_v7  ;;  %v6212_v7 = vld [vmem:[%s8310_s1 + $0xf40] ss:$24 sps:$4 sm:$0xff]  }
 0x1ee   : > { %4488 = vmatpush1.bf16.msra.mxu0 %v6128_v8  ;;  %4243 = vmatprep.subr.bf16.mxu1 %v6133_v54  ;;  %v6217_v8 = vld [vmem:[%s8310_s1 + $0xf6c] ss:$24 sps:$4 sm:$0xff]   ;;  %v6215_v54 = vld [vmem:[%s8310_s1 + $0xf68] ss:$24 sps:$4 sm:$0xff]  }
 0x1ef   : > { %4489 = vmatprep.subr.bf16.mxu0 %v6136_v9  ;;  %v6218_v9 = vld [vmem:[%s8310_s1 + $0xf70] ss:$24 sps:$4 sm:$0xff]  }
 0x1f1   : > { %4244 = vmatpush1.bf16.msra.mxu1 %v6131_v10  ;;  %v6223_v10 = vld [vmem:[%s8310_s1 + $0xf9c] ss:$24 sps:$4 sm:$0xff]  }
 0x1f2   : > { %4490 = vmatpush1.bf16.msra.mxu0 %v6134_v11  ;;  %4245 = vmatprep.subr.bf16.mxu1 %v6139_v22  ;;  %v6221_v11 = vld [vmem:[%s8310_s1 + $0xf98] ss:$24 sps:$4 sm:$0xff]  }
 0x1f3   : > { %4491 = vmatprep.subr.bf16.mxu0 %v6142_v12  ;;  %v6224_v22 = vld [vmem:[%s8310_s1 + $0xfa0] ss:$24 sps:$4 sm:$0xff]   ;;  %v6229_v12 = vld [vmem:[%s8310_s1 + $0xfcc] ss:$24 sps:$4 sm:$0xff]  }
 0x1f5   : > { %4246 = vmatpush1.bf16.msra.mxu1 %v6137_v13  ;;  %v6232_v13 = vld [vmem:[%s8310_s1 + $0xfd4] ss:$24 sps:$4 sm:$0xff]  }
 0x1f6   : > { %4492 = vmatpush1.bf16.msra.mxu0 %v6140_v14  ;;  %4247 = vmatprep.subr.bf16.mxu1 %v6145_v15  ;;  %v6227_v14 = vld [vmem:[%s8310_s1 + $0xfc8] ss:$24 sps:$4 sm:$0xff]  }
 0x1f7   : > { %4493 = vmatprep.subr.bf16.mxu0 %v6148_v18  ;;  %v6230_v15 = vld [vmem:[%s8310_s1 + $0xfd0] ss:$24 sps:$4 sm:$0xff]   ;;  %v6235_v18 = vld [vmem:[%s8310_s1 + $0xffc] ss:$24 sps:$4 sm:$0xff]  }
 0x1f9   : > { %4248 = vmatpush1.bf16.msra.mxu1 %v6143_v16  ;;  %v6238_v16 = vld [vmem:[%s8310_s1 + $0x1004] ss:$24 sps:$4 sm:$0xff]  }
 0x1fa   : > { %4494 = vmatpush1.bf16.msra.mxu0 %v6146_v19  ;;  %4249 = vmatprep.subr.bf16.mxu1 %v6151_v20  ;;  %v6233_v19 = vld [vmem:[%s8310_s1 + $0xff8] ss:$24 sps:$4 sm:$0xff]  }
 0x1fb   : > { %4495 = vmatprep.subr.bf16.mxu0 %v6154_v21  ;;  %v6236_v20 = vld [vmem:[%s8310_s1 + $0x1000] ss:$24 sps:$4 sm:$0xff]   ;;  %v6241_v21 = vld [vmem:[%s8310_s1 + $0x102c] ss:$24 sps:$4 sm:$0xff]  }
 0x1fd   : > { %4250 = vmatpush1.bf16.msra.mxu1 %v6149_v36  ;;  %v6244_v36 = vld [vmem:[%s8310_s1 + $0x1034] ss:$24 sps:$4 sm:$0xff]  }
 0x1fe   : > { %4496 = vmatpush1.bf16.msra.mxu0 %v6152_v24  ;;  %4251 = vmatprep.subr.bf16.mxu1 %v6157_v25  ;;  %v6239_v24 = vld [vmem:[%s8310_s1 + $0x1028] ss:$24 sps:$4 sm:$0xff]  }
 0x1ff   : > { %4497 = vmatprep.subr.bf16.mxu0 %v6160_v17  ;;  %v6242_v25 = vld [vmem:[%s8310_s1 + $0x1030] ss:$24 sps:$4 sm:$0xff]   ;;  %v6247_v17 = vld [vmem:[%s8310_s1 + $0x105c] ss:$24 sps:$4 sm:$0xff]  }
 0x201   : > { %4252 = vmatpush1.bf16.msra.mxu1 %v6155_v26  ;;  %v6250_v26 = vld [vmem:[%s8310_s1 + $0x1064] ss:$24 sps:$4 sm:$0xff]  }
 0x202   : > { %4498 = vmatpush1.bf16.msra.mxu0 %v6158_v27  ;;  %4253 = vmatprep.subr.bf16.mxu1 %v6163_v28  ;;  %v6245_v27 = vld [vmem:[%s8310_s1 + $0x1058] ss:$24 sps:$4 sm:$0xff]  }
 0x203   : > { %4499 = vmatprep.subr.bf16.mxu0 %v6166_v2  ;;  %v6248_v28 = vld [vmem:[%s8310_s1 + $0x1060] ss:$24 sps:$4 sm:$0xff]   ;;  %v6253_v2 = vld [vmem:[%s8310_s1 + $0x108c] ss:$24 sps:$4 sm:$0xff]  }
 0x205   : > { %4254 = vmatpush1.bf16.msra.mxu1 %v6161_v29  ;;  %v6256_v29 = vld [vmem:[%s8310_s1 + $0x1094] ss:$24 sps:$4 sm:$0xff]  }
 0x206   : > { %4500 = vmatpush1.bf16.msra.mxu0 %v6164_v30  ;;  %4255 = vmatprep.subr.bf16.mxu1 %v6169_v31  ;;  %v6251_v30 = vld [vmem:[%s8310_s1 + $0x1088] ss:$24 sps:$4 sm:$0xff]  }
 0x207   : > { %4501 = vmatprep.subr.bf16.mxu0 %v6172_v33  ;;  %v6254_v31 = vld [vmem:[%s8310_s1 + $0x1090] ss:$24 sps:$4 sm:$0xff]   ;;  %v6259_v33 = vld [vmem:[%s8310_s1 + $0x10bc] ss:$24 sps:$4 sm:$0xff]  }
 0x209   : > { %4256 = vmatpush1.bf16.msra.mxu1 %v6167_v34  ;;  %v6262_v34 = vld [vmem:[%s8310_s1 + $0x10c4] ss:$24 sps:$4 sm:$0xff]  }
 0x20a   : > { %4502 = vmatpush1.bf16.msra.mxu0 %v6170_v35  ;;  %4257 = vmatprep.subr.bf16.mxu1 %v6175_v49  ;;  %v6257_v35 = vld [vmem:[%s8310_s1 + $0x10b8] ss:$24 sps:$4 sm:$0xff]  }
 0x20b   : > { %4503 = vmatprep.subr.bf16.mxu0 %v6178_v39  ;;  %v6260_v49 = vld [vmem:[%s8310_s1 + $0x10c0] ss:$24 sps:$4 sm:$0xff]   ;;  %v6265_v39 = vld [vmem:[%s8310_s1 + $0x10ec] ss:$24 sps:$4 sm:$0xff]  }
 0x20d   : > { %4258 = vmatpush1.bf16.msra.mxu1 %v6173_v40  ;;  %v6268_v40 = vld [vmem:[%s8310_s1 + $0x10f4] ss:$24 sps:$4 sm:$0xff]  }
 0x20e   : > { %4504 = vmatpush1.bf16.msra.mxu0 %v6176_v41  ;;  %4259 = vmatprep.subr.bf16.mxu1 %v6181_v43  ;;  %v6263_v41 = vld [vmem:[%s8310_s1 + $0x10e8] ss:$24 sps:$4 sm:$0xff]  }
 0x20f   : > { %4505 = vmatprep.subr.bf16.mxu0 %v6184_v44  ;;  %v6266_v43 = vld [vmem:[%s8310_s1 + $0x10f0] ss:$24 sps:$4 sm:$0xff]   ;;  %v6271_v44 = vld [vmem:[%s8310_s1 + $0x111c] ss:$24 sps:$4 sm:$0xff]  }
 0x211   : > { %4260 = vmatpush1.bf16.msra.mxu1 %v6179_v45  ;;  %v6274_v45 = vld [vmem:[%s8310_s1 + $0x1124] ss:$24 sps:$4 sm:$0xff]  }
 0x212   : > { %4506 = vmatpush1.bf16.msra.mxu0 %v6182_v46  ;;  %4261 = vmatprep.subr.bf16.mxu1 %v6187_v47  ;;  %v6269_v46 = vld [vmem:[%s8310_s1 + $0x1118] ss:$24 sps:$4 sm:$0xff]  }
 0x213   : > { %4507 = vmatprep.subr.bf16.mxu0 %v6190_v50  ;;  %v6272_v47 = vld [vmem:[%s8310_s1 + $0x1120] ss:$24 sps:$4 sm:$0xff]   ;;  %v6277_v50 = vld [vmem:[%s8310_s1 + $0x114c] ss:$24 sps:$4 sm:$0xff]  }
 0x215   : > { %4262 = vmatpush1.bf16.msra.mxu1 %v6185_v52  ;;  %v6280_v52 = vld [vmem:[%s8310_s1 + $0x1154] ss:$24 sps:$4 sm:$0xff]  }
 0x216   : > { %4508 = vmatpush1.bf16.msra.mxu0 %v6188_v53  ;;  %4263 = vmatprep.subr.bf16.mxu1 %v6193_v56  ;;  %v6275_v53 = vld [vmem:[%s8310_s1 + $0x1148] ss:$24 sps:$4 sm:$0xff]  }
 0x217   : > { %4509 = vmatprep.subr.bf16.mxu0 %v6196_v57  ;;  %v6278_v56 = vld [vmem:[%s8310_s1 + $0x1150] ss:$24 sps:$4 sm:$0xff]   ;;  %v6283_v57 = vld [vmem:[%s8310_s1 + $0x117c] ss:$24 sps:$4 sm:$0xff]  }
 0x219   : > { %4264 = vmatpush1.bf16.msra.mxu1 %v6191_v58  ;;  %v6286_v58 = vld [vmem:[%s8310_s1 + $0x1184] ss:$24 sps:$4 sm:$0xff]  }
 0x21a   : > { %4510 = vmatpush1.bf16.msra.mxu0 %v6194_v60  ;;  %4265 = vmatprep.subr.bf16.mxu1 %v6199_v62  ;;  %v6281_v60 = vld [vmem:[%s8310_s1 + $0x1178] ss:$24 sps:$4 sm:$0xff]  }
 0x21b   : > { %4511 = vmatprep.subr.bf16.mxu0 %v6202_v63  ;;  %v6284_v62 = vld [vmem:[%s8310_s1 + $0x1180] ss:$24 sps:$4 sm:$0xff]   ;;  %v6289_v63 = vld [vmem:[%s8310_s1 + $0x11ac] ss:$24 sps:$4 sm:$0xff]  }
 0x21d   : > { %4266 = vmatpush1.bf16.msra.mxu1 %v6197_v0  ;;  %v6292_v0 = vld [vmem:[%s8310_s1 + $0x11b4] ss:$24 sps:$4 sm:$0xff]  }
 0x21e   : > { %4512 = vmatpush1.bf16.msra.mxu0 %v6200_v59  ;;  %4276 = vmatprep.subr.bf16.mxu1 %v6205_v1  ;;  %v6287_v59 = vld [vmem:[%s8310_s1 + $0x11a8] ss:$24 sps:$4 sm:$0xff]  }
 0x21f   : > { %4522 = vmatprep.subr.bf16.mxu0 %v6208_v3  ;;  %v6290_v1 = vld [vmem:[%s8310_s1 + $0x11b0] ss:$24 sps:$4 sm:$0xff]   ;;  %v6295_v3 = vld [vmem:[%s8310_s1 + $0x11dc] ss:$24 sps:$4 sm:$0xff]  }
 0x220   : > { %4268 = vmatmul.mubr.bf16.vlgmr.msra.gmra.mrb[4].mxu1 %v6753_v48 }
 0x221   : > { %4514 = vmatmul.mubr.bf16.vlgmr.msra.gmra.mrb[4].mxu0 %v6753_v48  ;;  %4277 = vmatpush1.bf16.msra.mxu1 %v6203_v61  ;;  %v6220_v48 = vld [vmem:[%s8310_s1 + $0xf74] ss:$24 sps:$4 sm:$0xff]   ;;  %v6298_v61 = vld [vmem:[%s8310_s1 + $0x11e4] ss:$24 sps:$4 sm:$0xff]  }
 0x222   : > { %4523 = vmatpush1.bf16.msra.mxu0 %v6206_v4  ;;  %4278 = vmatprep.subr.bf16.mxu1 %v6211_v5  ;;  %v6293_v4 = vld [vmem:[%s8310_s1 + $0x11d8] ss:$24 sps:$4 sm:$0xff]  }
 0x223   : > { %4524 = vmatprep.subr.bf16.mxu0 %v6214_v6  ;;  %4308 = vmatprep.mubr.bf16.mxu1 %v6894_v37  ;;  %v6296_v5 = vld [vmem:[%s8310_s1 + $0x11e0] ss:$24 sps:$4 sm:$0xff]   ;;  %v859_v6 = vsub.s32 2, %v6544_v42 }
 0x224   : > { %4554 = vmatprep.mubr.bf16.mxu0 %v6894_v37  ;;  %v6226_v37 = vld [vmem:[%s8310_s1 + $0xfa4] ss:$24 sps:$4 sm:$0xff]  }
 0x225   : > { %4279 = vmatpush1.bf16.msra.mxu1 %v6209_v51  ;;  %v867_v51 = vsub.s32 4, %v6544_v42 }
 0x226   : > { %4525 = vmatpush1.bf16.msra.mxu0 %v6212_v7  ;;  %4280 = vmatprep.subr.bf16.mxu1 %v6217_v8  ;;  %v863_v7 = vsub.s32 3, %v6544_v42  ;;  %v871_v8 = vsub.s32 5, %v6544_v42 }
 0x227   : > { %4526 = vmatprep.subr.bf16.mxu0 %v6220_v48  ;;  %v860_v48 = vrot.slane %v7730_v38, %v859_v6 }
 0x228   : > { %v4586_v42 = vrot.slane %v7756_v55, %v863_v7 }
 0x229   : > { %4281 = vmatpush1.bf16.msra.mxu1 %v6215_v54  ;;  %v868_v54 = vrot.slane %v7730_v38, %v867_v51 }
 0x22a   : > { %4527 = vmatpush1.bf16.msra.mxu0 %v6218_v9  ;;  %4282 = vmatprep.subr.bf16.mxu1 %v6223_v10  ;;  %v864_v9 = vrot.slane %v7730_v38, %v863_v7  ;;  %v872_v10 = vrot.slane %v7730_v38, %v871_v8 }
 0x22b   : > { %4528 = vmatprep.subr.bf16.mxu0 %v6226_v37 }
 0x22d   : > { %4283 = vmatpush1.bf16.msra.mxu1 %v6221_v11 }
 0x22e   : > { %4529 = vmatpush1.bf16.msra.mxu0 %v6224_v22  ;;  %4284 = vmatprep.subr.bf16.mxu1 %v6229_v12 }
 0x22f   : > { %4530 = vmatprep.subr.bf16.mxu0 %v6232_v13  ;;  %v4590_v13 = vrot.slane %v7756_v55, %v867_v51 }
 0x231   : > { %4285 = vmatpush1.bf16.msra.mxu1 %v6227_v14 }
 0x232   : > { %4531 = vmatpush1.bf16.msra.mxu0 %v6230_v15  ;;  %4286 = vmatprep.subr.bf16.mxu1 %v6235_v18 }
 0x233   : > { %4532 = vmatprep.subr.bf16.mxu0 %v6238_v16 }
 0x235   : > { %4287 = vmatpush1.bf16.msra.mxu1 %v6233_v19 }
 0x236   : > { %4533 = vmatpush1.bf16.msra.mxu0 %v6236_v20  ;;  %4288 = vmatprep.subr.bf16.mxu1 %v6241_v21  ;;  %v4594_v21 = vrot.slane %v7756_v55, %v871_v8 }
 0x237   : > { %4534 = vmatprep.subr.bf16.mxu0 %v6244_v36 }
 0x239   : > { %4289 = vmatpush1.bf16.msra.mxu1 %v6239_v24 }
 0x23a   : > { %4535 = vmatpush1.bf16.msra.mxu0 %v6242_v25  ;;  %4290 = vmatprep.subr.bf16.mxu1 %v6247_v17 }
 0x23b   : > { %4536 = vmatprep.subr.bf16.mxu0 %v6250_v26 }
 0x23d   : > { %4291 = vmatpush1.bf16.msra.mxu1 %v6245_v27 }
 0x23e   : > { %4537 = vmatpush1.bf16.msra.mxu0 %v6248_v28  ;;  %4292 = vmatprep.subr.bf16.mxu1 %v6253_v2 }
 0x23f   : > { %4538 = vmatprep.subr.bf16.mxu0 %v6256_v29 }
 0x241   : > { %4293 = vmatpush1.bf16.msra.mxu1 %v6251_v30 }
 0x242   : > { %4539 = vmatpush1.bf16.msra.mxu0 %v6254_v31  ;;  %4294 = vmatprep.subr.bf16.mxu1 %v6259_v33 }
 0x243   : > { %4540 = vmatprep.subr.bf16.mxu0 %v6262_v34 }
 0x245   : > { %4295 = vmatpush1.bf16.msra.mxu1 %v6257_v35 }
 0x246   : > { %4541 = vmatpush1.bf16.msra.mxu0 %v6260_v49  ;;  %4296 = vmatprep.subr.bf16.mxu1 %v6265_v39  ;;  %v6350_v39 = vmov 0.0  }
 0x247   : > { %4542 = vmatprep.subr.bf16.mxu0 %v6268_v40  ;;  %266 = vst.msk [vmem:[#allocation2] sm:$0x1] %vm265_vm1, %v6350_v39  ;;  %267 = vst.msk [vmem:[#allocation3] sm:$0x1] %vm265_vm1, %v6350_v39  ;;  %v4626_v40 = vstv %s5326_s13 }
 0x249   : > { %4297 = vmatpush1.bf16.msra.mxu1 %v6263_v41 }
 0x24a   : > { %4543 = vmatpush1.bf16.msra.mxu0 %v6266_v43  ;;  %4298 = vmatprep.subr.bf16.mxu1 %v6271_v44 }
 0x24b   : > { %4544 = vmatprep.subr.bf16.mxu0 %v6274_v45 }
 0x24d   : > { %4299 = vmatpush1.bf16.msra.mxu1 %v6269_v46  ;;  %v4616_v46 = vstv %s4615_s14 }
 0x24e   : > { %4545 = vmatpush1.bf16.msra.mxu0 %v6272_v47  ;;  %4300 = vmatprep.subr.bf16.mxu1 %v6277_v50  ;;  %v4635_v7 = vld [vmem:[#allocation2] sm:$0x1] }
 0x24f   : > { %4546 = vmatprep.subr.bf16.mxu0 %v6280_v52 }
 0x251   : > { %4301 = vmatpush1.bf16.msra.mxu1 %v6275_v53 }
 0x252   : > { %4547 = vmatpush1.bf16.msra.mxu0 %v6278_v56  ;;  %4302 = vmatprep.subr.bf16.mxu1 %v6283_v57 }
 0x253   : > { %4548 = vmatprep.subr.bf16.mxu0 %v6286_v58 }
 0x255   : > { %4303 = vmatpush1.bf16.msra.mxu1 %v6281_v60 }
 0x256   : > { %4549 = vmatpush1.bf16.msra.mxu0 %v6284_v62  ;;  %4304 = vmatprep.subr.bf16.mxu1 %v6289_v63 }
 0x257   : > { %4550 = vmatprep.subr.bf16.mxu0 %v6292_v0 }
 0x259   : > { %4305 = vmatpush1.bf16.msra.mxu1 %v6287_v59 }
 0x25a   : > { %4551 = vmatpush1.bf16.msra.mxu0 %v6290_v1  ;;  %4306 = vmatprep.subr.bf16.mxu1 %v6295_v3 }
 0x25b   : > { %4552 = vmatprep.subr.bf16.mxu0 %v6298_v61 }
 0x25d   : > { %4307 = vmatpush1.bf16.msra.mxu1 %v6293_v4 }
 0x25e   : > { %4553 = vmatpush1.bf16.msra.mxu0 %v6296_v5  ;;  %v4647_v5 = vld [vmem:[#allocation3] sm:$0x1] }
 0x260   : > { %4309 = vmatmul.mubr.bf16.vlgmr.msra.gmra.mrb[4].mxu1 %v6874_v32 }
 0x261   : > { %4555 = vmatmul.mubr.bf16.vlgmr.msra.gmra.mrb[4].mxu0 %v6874_v32  ;;  %v4582_v32 = vrot.slane %v7756_v55, %v859_v6 }
 0x333   : > { %v4310_v37 = vpop.f32.mrb[4].mxu1 }
 0x334   : > { %v4556_v11 = vpop.f32.mrb[4].mxu0  ;;  %v5334_v22 = vadd.f32 %v4310_v37, %v860_v48  ;;  %v4312_v14 = vpop.f32.mrb[5].mxu1 }
 0x335   : > { %v5336_v12 = vadd.f32 %v4556_v11, %v868_v54  ;;  %v4558_v15 = vpop.f32.mrb[5].mxu0  ;;  %v5335_v18 = vadd.f32 %v4312_v14, %v864_v9  ;;  %v4314_v19 = vpop.f32.mrb[6].mxu1 }
 0x336   : > { %v5337_v16 = vadd.f32 %v4558_v15, %v872_v10  ;;  %v4560_v20 = vpop.f32.mrb[6].mxu0  ;;  %v4565_v36 = vmax.f32 %v5334_v22, 0.0  ;;  %v4315_v24 = vpop.f32.mrb[7].mxu1 }
 0x337   : > { %v4567_v38 = vmax.f32 %v5336_v12, 0.0  ;;  %v4561_v25 = vpop.f32.mrb[7].mxu0  ;;  %v4566_v17 = vmax.f32 %v5335_v18, 0.0 }
 0x338   : > { %v4568_v26 = vmax.f32 %v5337_v16, 0.0  ;;  %v4603_v27 = vmul.f32 %v4582_v32, %v4565_v36 }
 0x339   : > { %v4605_v28 = vmul.f32 %v4590_v13, %v4567_v38  ;;  %v4604_v2 = vmul.f32 %v4586_v42, %v4566_v17 }
 0x33a   : > { %v4606_v29 = vmul.f32 %v4594_v21, %v4568_v26  ;;  %v4611_v31 = vsel %vm4607_vm0, %v4603_v27, 0.0 }
 0x33b   : > { %v4619_v30 = vsel %vm4607_vm0, %v4605_v28, 0.0  ;;  %v4618_v33 = vsel %vm4607_vm0, %v4604_v2, 0.0  ;;  %v4612_v34 = vadd.f32 %v4611_v31, %v7798_v23 }
 0x33c   : > { %v4620_v35 = vadd.f32 %v4619_v30, %v4618_v33  ;;  %v4621_v55 = vsel %vm4607_vm0, %v4606_v29, 0.0 }
 0x33e   : > { %v4622_v49 = vadd.f32 %v4621_v55, %v4620_v35 }
 0x340   : > { %4623 = vadd.xlane.f32.xlu0 %v4622_v49 }
 0x344   : > { %4613 = vadd.xlane.f32.xlu0 %v4612_v34 }
 0x3cd   : > { %v4624_v41 = vpop.xlane.xlu0 %4623 }
 0x3ce   : > { %v4627_v43 = vadd.f32 %v4626_v40, %v4624_v41 }
 0x3d0   : > { %v5327_v44 = vmul.f32 -1.442695, %v4627_v43 }
 0x3d1   : > { %v4614_v47 = vpop.xlane.xlu0 %4613 }
 0x3d2   : > { %6299 = vpow2.f32 %v5327_v44  ;;  %v4617_v50 = vadd.f32 %v4616_v46, %v4614_v47 }
 0x3d4   : > { %v4628_v52 = vmax.f32 %v4617_v50, 0.0 }
 0x3dc   : > { %v6300_v23 = vpop.eup %6299 }
 0x3dd   : > { %v4632_v45 = vadd.f32 1.0, %v6300_v23 }
 0x3df   : > { %6301 = vrcp.f32 %v4632_v45 }
 0x3e9   : > { %v6302_v53 = vpop.eup %6301 }
 0x3ea   : > { %v4648_v56 = vsel %vm4607_vm0, %v6302_v53, 0.0  ;;  %v4636_v57 = vmul.f32 %v6302_v53, %v4628_v52 }
 0x3eb   : > { %v4649_v58 = vrot.slane %v4648_v56, 4 }
 0x3ec   : > { %v4637_v60 = vsel %vm4607_vm0, %v4636_v57, 0.0 }
 0x3ed   : > { %v4650_v62 = vadd.f32 %v4649_v58, %v4648_v56  ;;  %v4638_v63 = vrot.slane %v4637_v60, 4 }
 0x3ef   : > { %v4651_v0 = vrot.slane %v4650_v62, 2  ;;  %v4639_v59 = vadd.f32 %v4638_v63, %v4637_v60 }
 0x3f1   : > { %v4652_v1 = vadd.f32 %v4651_v0, %v4650_v62  ;;  %v4640_v3 = vrot.slane %v4639_v59, 2 }
 0x3f3   : > { %v4653_v61 = vrot.slane %v4652_v1, 1  ;;  %v4641_v4 = vadd.f32 %v4640_v3, %v4639_v59 }
 0x3f5   : > { %v4654_v6 = vadd.f32 %v4653_v61, %v4652_v1  ;;  %v4642_v51 = vrot.slane %v4641_v4, 1 }
 0x3f7   : > { %v4655_v8 = vadd.f32 %v4654_v6, %v4647_v5  ;;  %v4643_v48 = vadd.f32 %v4642_v51, %v4641_v4 }
 0x3f9   : > { %4656 = vst.msk [vmem:[#allocation3] sm:$0x1] %vm265_vm1, %v4655_v8  ;;  %v4644_v54 = vadd.f32 %v4643_v48, %v4635_v7 }
 0x3fb   : > { %4646 = vst.msk [vmem:[#allocation2] sm:$0x1] %vm265_vm1, %v4644_v54 }
 0x400   : > { %v4661_v9 = vld [vmem:[#allocation3] sm:$0x1] }
 0x401   : > { %6303 = vrcp.f32 %v4661_v9 }
 0x402   : > { %v4660_v37 = vld [vmem:[#allocation2] sm:$0x1] }
 0x40b   : > { %v6304_v10 = vpop.eup %6303 }
 0x40c   : > { %v4663_v11 = vmul.f32 %v6304_v10, %v4660_v37 }
 0x40e   : > { %4664 = vst.msk [vmem:[%s260_s21] sm:$0x1] %vm265_vm1, %v4663_v11 }
 0x40f PF: > { %s16_s20 = sadd.s32 1, %s6346_s20   ;;  %s8317_s18 = smov %s6342_s19 }
 0x410   : > { %p13_p2 = scmp.ge.s32.totalorder %s16_s20, 4   ;;  %s8318_s19 = smov %s8320_s22 }
 0x412   :  { %15 = sbr.rel (!%p13_p2) target bundleno = 2 (0x2), region = 83 }
 0x419   :  { %4682 = vsyncpa [#allocation5], 1 }
 0x41a   :  { %4684 = vsyncpa [#allocation5 + $0x1], 1 }

</bundles_post_ra>
